<compile_context>
chip_gen: v7x
topology: tpu7x:2x2x1
jax: 0.10.0
libtpu: 0.0.40
codegen_flags: <defaults>
</compile_context>

<pallas_src>
import math
import functools

import jax
import jax.numpy as jnp
import numpy as np
from jax.experimental import pallas as pl
from jax.experimental.pallas import tpu as pltpu

BN_EPS = 1e-5
VMEM_LIMIT = 32 * 1024 * 1024  # <= default scoped VMEM on v6e/v7x, raises v5e


# --------------------------------------------------------------------------
# Shared depthwise-3x3 accumulation on an in-VMEM value
#   x: (H, W, C) f32, w_ref: (9, C) f32 taps [kh*3+kw, c]  ->  (Ho, W, C) f32
#   zero padding is built in VMEM; dy and stride-2 rows use free leading-dim
#   slices/reshapes; dx uses 3 column-shifted views (not 9 materialized taps).
# --------------------------------------------------------------------------
def _depthwise3x3_acc(x, w_ref, stride, Ho):
    H, W, C = x.shape
    zrow = jnp.zeros((1, W, C), jnp.float32)
    xh = jnp.concatenate([zrow, x, zrow], axis=0)            # (H+2, W, C) H-pad
    zcol = jnp.zeros((H + 2, 1, C), jnp.float32)

    acc = jnp.zeros((Ho, W, C), jnp.float32)
    for kw in range(3):                                      # 3 column-shifted views
        if kw == 0:
            xs = jnp.concatenate([zcol, xh[:, :W - 1, :]], axis=1)   # x[:, j-1]
        elif kw == 1:
            xs = xh                                                  # x[:, j]
        else:
            xs = jnp.concatenate([xh[:, 1:, :], zcol], axis=1)       # x[:, j+1]
        if stride == 2:
            xr = xs.reshape((H + 2) // 2, 2, W, C)           # leading-dim split (free)
        for kh in range(3):                                  # dy via leading-dim slices
            tap = w_ref[kh * 3 + kw, :]                      # (C,)
            if stride == 1:
                rows = xs[kh:kh + Ho]                        # (Ho, W, C)
            else:
                rows = xr[kh // 2: kh // 2 + Ho, kh % 2]     # rows 2i+kh
            acc = acc + rows * tap
    return acc


# --------------------------------------------------------------------------
# PRIMARY PATH: fully fused inverted-residual kernel (one grid point / image)
# --------------------------------------------------------------------------
def _fused_ir_kernel(*refs, stride, has_expand, add_residual):
    i = 0
    x_ref = refs[i]; i += 1
    if has_expand:
        pw_w_ref, pw_s_ref, pw_b_ref = refs[i:i + 3]; i += 3
    dw_w_ref, dw_s_ref, dw_b_ref = refs[i:i + 3]; i += 3
    pwl_w_ref, pwl_s_ref, pwl_b_ref = refs[i:i + 3]; i += 3
    o_ref = refs[i]

    H, W, Cin = x_ref.shape[1], x_ref.shape[2], x_ref.shape[3]
    Ho, oup = o_ref.shape[1], o_ref.shape[3]

    x = x_ref[0]                                             # (H, W, Cin) bf16

    # ---- expand 1x1 conv + BN + ReLU6 (MXU) -------------------------------
    if has_expand:
        h = jnp.dot(x.reshape(H * W, Cin), pw_w_ref[...],
                    preferred_element_type=jnp.float32)      # (H*W, hidden) f32
        h = jnp.clip(h * pw_s_ref[...] + pw_b_ref[...], 0.0, 6.0)
        C = pw_w_ref.shape[1]
        h = h.reshape(H, W, C)
    else:
        h = x.astype(jnp.float32)
        C = Cin

    # ---- depthwise 3x3 + BN + ReLU6 (VPU, stays in VMEM) ------------------
    acc = _depthwise3x3_acc(h, dw_w_ref, stride, Ho)         # (Ho, W, C) f32
    d = jnp.clip(acc * dw_s_ref[0] + dw_b_ref[0], 0.0, 6.0)

    # ---- project 1x1 conv + BN (+ fused residual) (MXU) -------------------
    y = jnp.dot(d.reshape(Ho * W, C).astype(jnp.bfloat16), pwl_w_ref[...],
                preferred_element_type=jnp.float32)          # (Ho*W, oup) f32
    y = y * pwl_s_ref[...] + pwl_b_ref[...]
    if add_residual:                                         # stride==1, inp==oup
        y = y + x.reshape(H * W, Cin).astype(jnp.float32)
    o_ref[0] = y.reshape(Ho, W, oup).astype(o_ref.dtype)


def fused_inverted_residual(x, params, *, stride, has_expand, identity):
    """x: (N,H,W,Cin) bf16 NHWC. Returns (N,Ho,Wo,oup) bf16 NHWC."""
    N, H, W, Cin = x.shape
    hidden = params["dw_w"].shape[1]
    oup = params["pwl_w"].shape[1]
    Ho = H if stride == 1 else H // 2

    in_specs = [pl.BlockSpec((1, H, W, Cin), lambda n: (n, 0, 0, 0))]
    args = [x]
    if has_expand:
        in_specs += [pl.BlockSpec((Cin, hidden), lambda n: (0, 0)),
                     pl.BlockSpec((1, hidden), lambda n: (0, 0)),
                     pl.BlockSpec((1, hidden), lambda n: (0, 0))]
        args += [params["pw_w"],
                 params["pw_scale"].reshape(1, hidden).astype(jnp.float32),
                 params["pw_bias"].reshape(1, hidden).astype(jnp.float32)]
    in_specs += [pl.BlockSpec((9, hidden), lambda n: (0, 0)),
                 pl.BlockSpec((1, hidden), lambda n: (0, 0)),
                 pl.BlockSpec((1, hidden), lambda n: (0, 0)),
                 pl.BlockSpec((hidden, oup), lambda n: (0, 0)),
                 pl.BlockSpec((1, oup), lambda n: (0, 0)),
                 pl.BlockSpec((1, oup), lambda n: (0, 0))]
    args += [params["dw_w"],
             params["dw_scale"].reshape(1, hidden).astype(jnp.float32),
             params["dw_bias"].reshape(1, hidden).astype(jnp.float32),
             params["pwl_w"],
             params["pwl_scale"].reshape(1, oup).astype(jnp.float32),
             params["pwl_bias"].reshape(1, oup).astype(jnp.float32)]

    out = pl.pallas_call(
        functools.partial(_fused_ir_kernel, stride=stride,
                          has_expand=has_expand, add_residual=identity),
        out_shape=jax.ShapeDtypeStruct((N, Ho, W, oup), jnp.bfloat16),
        grid=(N,),
        in_specs=in_specs,
        out_specs=pl.BlockSpec((1, Ho, W, oup), lambda n: (n, 0, 0, 0)),
        compiler_params=pltpu.CompilerParams(
            dimension_semantics=("parallel",),
            vmem_limit_bytes=VMEM_LIMIT),
    )(*args)
    if stride == 2:
        out = out[:, :, ::2, :]   # column subsample (rows already strided in-kernel)
    return out


def _fused_vmem_ok(H, W, hidden, inp, oup):
    # rough live-value estimate inside the fused kernel: a handful of f32
    # copies of the padded hidden tensor + double-buffered bf16 IO blocks.
    hidden_bytes = (H + 2) * W * hidden * 4
    io_bytes = H * W * (inp + oup) * 2 * 2 * 2
    return 6 * hidden_bytes + io_bytes < VMEM_LIMIT // 2


# --------------------------------------------------------------------------
# FALLBACK PATH (large working sets): tiled 1x1-conv matmul kernel
# --------------------------------------------------------------------------
def _pick_tile_m(M):
    for t in (256, 512, 128, 64, 32, 16, 8):
        if M % t == 0:
            return t
    return M


def _pick_tile_n(N):
    if N <= 512:
        return N
    for t in (512, 256, 128):
        if N % t == 0:
            return t
    return N


def _matmul_bn_act_kernel(x_ref, w_ref, scale_ref, bias_ref, *rest,
                          act, add_residual):
    if add_residual:
        res_ref, o_ref = rest
    else:
        (o_ref,) = rest
    y = jnp.dot(x_ref[...], w_ref[...], preferred_element_type=jnp.float32)
    y = y * scale_ref[...] + bias_ref[...]
    if act:
        y = jnp.clip(y, 0.0, 6.0)           # ReLU6
    if add_residual:
        y = y + res_ref[...].astype(jnp.float32)
    o_ref[...] = y.astype(o_ref.dtype)


def matmul_bn_act(x2d, w, scale, bias, act, residual=None):
    """y = clip((x2d @ w) * scale + bias, 0, 6)[+residual]; bf16 in/out, f32 acc."""
    M, K = x2d.shape
    N = w.shape[1]
    tm = _pick_tile_m(M)
    tn = _pick_tile_n(N)
    grid = (M // tm, N // tn)

    in_specs = [
        pl.BlockSpec((tm, K), lambda i, j: (i, 0)),
        pl.BlockSpec((K, tn), lambda i, j: (0, j)),
        pl.BlockSpec((1, tn), lambda i, j: (0, j)),
        pl.BlockSpec((1, tn), lambda i, j: (0, j)),
    ]
    args = [x2d.astype(jnp.bfloat16), w.astype(jnp.bfloat16),
            scale.reshape(1, N).astype(jnp.float32),
            bias.reshape(1, N).astype(jnp.float32)]
    if residual is not None:
        in_specs.append(pl.BlockSpec((tm, tn), lambda i, j: (i, j)))
        args.append(residual.astype(jnp.bfloat16))

    return pl.pallas_call(
        functools.partial(_matmul_bn_act_kernel, act=act,
                          add_residual=residual is not None),
        out_shape=jax.ShapeDtypeStruct((M, N), jnp.bfloat16),
        grid=grid,
        in_specs=in_specs,
        out_specs=pl.BlockSpec((tm, tn), lambda i, j: (i, j)),
        compiler_params=pltpu.CompilerParams(
            dimension_semantics=("parallel", "parallel"),
            vmem_limit_bytes=VMEM_LIMIT),
    )(*args)


def conv1x1_bn(x, w, scale, bias, act, residual=None):
    N, H, W, C = x.shape
    Cout = w.shape[1]
    r2d = None if residual is None else residual.reshape(N * H * W, Cout)
    y = matmul_bn_act(x.reshape(N * H * W, C), w, scale, bias, act, r2d)
    return y.reshape(N, H, W, Cout)


# --------------------------------------------------------------------------
# FALLBACK PATH: depthwise 3x3 + BN + ReLU6 kernel
# --------------------------------------------------------------------------
def _dw3x3_bn_relu6_kernel(x_ref, w_ref, scale_ref, bias_ref, o_ref, *, stride):
    Ho = o_ref.shape[1]
    acc = _depthwise3x3_acc(x_ref[0].astype(jnp.float32), w_ref, stride, Ho)
    y = acc * scale_ref[0] + bias_ref[0]
    o_ref[0] = jnp.clip(y, 0.0, 6.0).astype(o_ref.dtype)


def dw3x3_bn_relu6(x, w9c, scale, bias, stride):
    """Depthwise 3x3 conv (pad=1) + folded BN + ReLU6.  x: (N,H,W,C) NHWC bf16."""
    N, H, W, C = x.shape
    Ho = H if stride == 1 else H // 2
    out = pl.pallas_call(
        functools.partial(_dw3x3_bn_relu6_kernel, stride=stride),
        out_shape=jax.ShapeDtypeStruct((N, Ho, W, C), jnp.bfloat16),
        grid=(N,),
        in_specs=[
            pl.BlockSpec((1, H, W, C), lambda n: (n, 0, 0, 0)),
            pl.BlockSpec((9, C), lambda n: (0, 0)),
            pl.BlockSpec((1, C), lambda n: (0, 0)),
            pl.BlockSpec((1, C), lambda n: (0, 0)),
        ],
        out_specs=pl.BlockSpec((1, Ho, W, C), lambda n: (n, 0, 0, 0)),
        compiler_params=pltpu.CompilerParams(
            dimension_semantics=("parallel",),
            vmem_limit_bytes=VMEM_LIMIT),
    )(x.astype(jnp.bfloat16), w9c,
      scale.reshape(1, C).astype(jnp.float32),
      bias.reshape(1, C).astype(jnp.float32))
    if stride == 2:
        out = out[:, :, ::2, :]
    return out


# --------------------------------------------------------------------------
# Parameter init (inference-mode BN fold) + forward
# --------------------------------------------------------------------------
def _conv_weight(key, shape_oikk):
    O, I, kh, kw = shape_oikk
    n = kh * kw * O
    return jax.random.normal(key, shape_oikk, jnp.float32) * math.sqrt(2.0 / n)


def _bn_fold(C):
    # gamma=1, beta=0, running mean=0, running var=1  ->  scale, bias
    scale = jnp.full((C,), 1.0 / math.sqrt(1.0 + BN_EPS), jnp.float32)
    bias = jnp.zeros((C,), jnp.float32)
    return scale, bias


def init_inverted_residual(key, inp, oup, stride, expand_ratio):
    assert stride in (1, 2)
    hidden = int(round(inp * expand_ratio))
    # Structural config stays OUTSIDE the traced params pytree (static under jit).
    cfg = {"stride": stride, "expand_ratio": expand_ratio,
           "identity": (stride == 1 and inp == oup)}
    k_pw, k_dw, k_pwl = jax.random.split(key, 3)
    params = {}
    if expand_ratio != 1:
        wpw = _conv_weight(k_pw, (hidden, inp, 1, 1))
        params["pw_w"] = wpw.reshape(hidden, inp).T.astype(jnp.bfloat16)   # (inp, hidden)
        params["pw_scale"], params["pw_bias"] = _bn_fold(hidden)
    wdw = _conv_weight(k_dw, (hidden, 1, 3, 3))
    params["dw_w"] = wdw.reshape(hidden, 9).T                              # (9, hidden) f32
    params["dw_scale"], params["dw_bias"] = _bn_fold(hidden)
    wpl = _conv_weight(k_pwl, (oup, hidden, 1, 1))
    params["pwl_w"] = wpl.reshape(oup, hidden).T.astype(jnp.bfloat16)      # (hidden, oup)
    params["pwl_scale"], params["pwl_bias"] = _bn_fold(oup)
    return params, cfg


def inverted_residual_forward(params, x_nchw, *, cfg, force_path=None):
    x = jnp.transpose(x_nchw, (0, 2, 3, 1)).astype(jnp.bfloat16)  # NCHW -> NHWC bf16
    N, H, W, Cin = x.shape
    hidden = params["dw_w"].shape[1]
    oup = params["pwl_w"].shape[1]

    use_fused = _fused_vmem_ok(H, W, hidden, Cin, oup)
    if force_path == "fused":
        use_fused = True
    elif force_path == "unfused":
        use_fused = False

    if use_fused:
        out = fused_inverted_residual(x, params, stride=cfg["stride"],
                                      has_expand=(cfg["expand_ratio"] != 1),
                                      identity=cfg["identity"])
    else:
        out = x
        if cfg["expand_ratio"] != 1:
            out = conv1x1_bn(out, params["pw_w"], params["pw_scale"],
                             params["pw_bias"], act=True)
        out = dw3x3_bn_relu6(out, params["dw_w"], params["dw_scale"],
                             params["dw_bias"], cfg["stride"])
        res = x if cfg["identity"] else None                  # fused into epilogue
        out = conv1x1_bn(out, params["pwl_w"], params["pwl_scale"],
                         params["pwl_bias"], act=False, residual=res)
    return jnp.transpose(out, (0, 3, 1, 2)).astype(jnp.float32)   # NHWC -> NCHW f32


# --------------------------------------------------------------------------
# Pure-JAX f32 reference (loose numerical sanity check)
# --------------------------------------------------------------------------
def _ref_forward(params, x_nchw, cfg):
    x = jnp.transpose(x_nchw, (0, 2, 3, 1)).astype(jnp.float32)
    out = x
    if cfg["expand_ratio"] != 1:
        out = jnp.clip(out @ params["pw_w"].astype(jnp.float32)
                       * params["pw_scale"] + params["pw_bias"], 0.0, 6.0)
    N, H, W, C = out.shape
    s = cfg["stride"]
    Ho, Wo = H // s, W // s
    xp = jnp.pad(out, ((0, 0), (1, 1), (1, 1), (0, 0)))
    acc = jnp.zeros((N, Ho, Wo, C), jnp.float32)
    for kh in range(3):
        for kw in range(3):
            acc = acc + xp[:, kh:kh + s * (Ho - 1) + 1:s,
                           kw:kw + s * (Wo - 1) + 1:s, :] * params["dw_w"][kh * 3 + kw]
    out = jnp.clip(acc * params["dw_scale"] + params["dw_bias"], 0.0, 6.0)
    out = out @ params["pwl_w"].astype(jnp.float32) * params["pwl_scale"] + params["pwl_bias"]
    if cfg["identity"]:
        out = out + x
    return jnp.transpose(out, (0, 3, 1, 2))


# --------------------------------------------------------------------------
if __name__ == "__main__":
    key = jax.random.PRNGKey(0)
    k1, k2, kx = jax.random.split(key, 3)
    x = jax.random.normal(kx, (2, 16, 16, 16), jnp.float32)   # (N, C, H, W)

    # Block 1: identity branch (stride=1, inp==oup, expand_ratio=6) — fused path
    p1, c1 = init_inverted_residual(k1, inp=16, oup=16, stride=1, expand_ratio=6)
    f1 = jax.jit(functools.partial(inverted_residual_forward, cfg=c1))
    y1 = f1(p1, x)
    jax.block_until_ready(y1)
    assert y1.shape == (2, 16, 16, 16), y1.shape
    ref1 = _ref_forward(p1, x, c1)
    np.testing.assert_allclose(np.asarray(y1), np.asarray(ref1),
                               rtol=5e-2, atol=5e-2)

    # Same block through the large-shape fallback path (tiled matmul + dw kernels)
    f1u = jax.jit(functools.partial(inverted_residual_forward, cfg=c1,
                                    force_path="unfused"))
    y1u = f1u(p1, x)
    jax.block_until_ready(y1u)
    np.testing.assert_allclose(np.asarray(y1u), np.asarray(ref1),
                               rtol=5e-2, atol=5e-2)

    # Block 2: downsampling branch (stride=2, expand_ratio=1, no expand conv)
    p2, c2 = init_inverted_residual(k2, inp=16, oup=24, stride=2, expand_ratio=1)
    f2 = jax.jit(functools.partial(inverted_residual_forward, cfg=c2))
    y2 = f2(p2, x)
    jax.block_until_ready(y2)
    assert y2.shape == (2, 24, 8, 8), y2.shape
    np.testing.assert_allclose(np.asarray(y2), np.asarray(_ref_forward(p2, x, c2)),
                               rtol=5e-2, atol=5e-2)

    print("KERNEL_OK")
</pallas_src>

<mosaic_0001>
module attributes {stable_mosaic.version = 11 : i64} {
  func.func @_fused_ir_kernel(%arg0: i32, %arg1: memref<1x16x16x16xbf16, #tpu.memory_space<vmem>>, %arg2: memref<16x96xbf16, #tpu.memory_space<vmem>>, %arg3: memref<1x96xf32, #tpu.memory_space<vmem>>, %arg4: memref<1x96xf32, #tpu.memory_space<vmem>>, %arg5: memref<9x96xf32, #tpu.memory_space<vmem>>, %arg6: memref<1x96xf32, #tpu.memory_space<vmem>>, %arg7: memref<1x96xf32, #tpu.memory_space<vmem>>, %arg8: memref<96x16xbf16, #tpu.memory_space<vmem>>, %arg9: memref<1x16xf32, #tpu.memory_space<vmem>>, %arg10: memref<1x16xf32, #tpu.memory_space<vmem>>, %arg11: memref<1x16x16x16xbf16, #tpu.memory_space<vmem>>) attributes {dimension_semantics = [#tpu.dimension_semantics<parallel>], iteration_bounds = array<i64: 2>, scalar_prefetch = 0 : i64, scratch_operands = 0 : i64, tpu.core_type = #tpu.core_type<tc>, window_params = [{transform_indices = @transform_0, window_bounds = array<i64: 1, 16, 16, 16>}, {pipeline_mode = #tpu.pipeline_mode<synchronous>, transform_indices = @transform_1, window_bounds = array<i64: 16, 96>}, {pipeline_mode = #tpu.pipeline_mode<synchronous>, transform_indices = @transform_2, window_bounds = array<i64: 1, 96>}, {pipeline_mode = #tpu.pipeline_mode<synchronous>, transform_indices = @transform_3, window_bounds = array<i64: 1, 96>}, {pipeline_mode = #tpu.pipeline_mode<synchronous>, transform_indices = @transform_4, window_bounds = array<i64: 9, 96>}, {pipeline_mode = #tpu.pipeline_mode<synchronous>, transform_indices = @transform_5, window_bounds = array<i64: 1, 96>}, {pipeline_mode = #tpu.pipeline_mode<synchronous>, transform_indices = @transform_6, window_bounds = array<i64: 1, 96>}, {pipeline_mode = #tpu.pipeline_mode<synchronous>, transform_indices = @transform_7, window_bounds = array<i64: 96, 16>}, {pipeline_mode = #tpu.pipeline_mode<synchronous>, transform_indices = @transform_8, window_bounds = array<i64: 1, 16>}, {pipeline_mode = #tpu.pipeline_mode<synchronous>, transform_indices = @transform_9, window_bounds = array<i64: 1, 16>}, {transform_indices = @transform_10, window_bounds = array<i64: 1, 16, 16, 16>}]} {
    %c0 = arith.constant 0 : index
    %c0_0 = arith.constant 0 : index
    %c0_1 = arith.constant 0 : index
    %c0_2 = arith.constant 0 : index
    %0 = vector.load %arg1[%c0, %c0_0, %c0_1, %c0_2] : memref<1x16x16x16xbf16, #tpu.memory_space<vmem>>, vector<1x16x16x16xbf16>
    %1 = vector.shape_cast %0 : vector<1x16x16x16xbf16> to vector<16x16x16xbf16>
    %2 = vector.shape_cast %1 : vector<16x16x16xbf16> to vector<256x16xbf16>
    %c0_3 = arith.constant 0 : index
    %c0_4 = arith.constant 0 : index
    %3 = vector.load %arg2[%c0_3, %c0_4] : memref<16x96xbf16, #tpu.memory_space<vmem>>, vector<16x96xbf16>
    %cst = arith.constant dense<0.000000e+00> : vector<256x96xf32>
    %4 = tpu.matmul %2, %3, %cst {dimension_numbers = #tpu.dot_dimension_numbers<[1], [0], [0], [1], [0, 0, 1, 1], [], []>} : vector<256x16xbf16>, vector<16x96xbf16>, vector<256x96xf32> -> vector<256x96xf32>
    %c0_5 = arith.constant 0 : index
    %c0_6 = arith.constant 0 : index
    %5 = vector.load %arg3[%c0_5, %c0_6] : memref<1x96xf32, #tpu.memory_space<vmem>>, vector<1x96xf32>
    %6 = vector.broadcast %5 : vector<1x96xf32> to vector<256x96xf32>
    %7 = arith.mulf %4, %6 : vector<256x96xf32>
    %c0_7 = arith.constant 0 : index
    %c0_8 = arith.constant 0 : index
    %8 = vector.load %arg4[%c0_7, %c0_8] : memref<1x96xf32, #tpu.memory_space<vmem>>, vector<1x96xf32>
    %9 = vector.broadcast %8 : vector<1x96xf32> to vector<256x96xf32>
    %10 = arith.addf %7, %9 : vector<256x96xf32>
    %cst_9 = arith.constant 0.000000e+00 : f32
    %cst_10 = arith.constant 6.000000e+00 : f32
    %11 = vector.broadcast %cst_9 : f32 to vector<256x96xf32>
    %12 = arith.maximumf %11, %10 : vector<256x96xf32>
    %13 = vector.broadcast %cst_10 : f32 to vector<256x96xf32>
    %14 = arith.minimumf %13, %12 : vector<256x96xf32>
    %15 = vector.shape_cast %14 : vector<256x96xf32> to vector<16x16x96xf32>
    %cst_11 = arith.constant 0.000000e+00 : f32
    %16 = vector.broadcast %cst_11 : f32 to vector<1x16x96xf32>
    %17 = tpu.concatenate %16, %15, %16 in 0 : vector<1x16x96xf32>, vector<16x16x96xf32>, vector<1x16x96xf32> -> vector<18x16x96xf32>
    %cst_12 = arith.constant 0.000000e+00 : f32
    %18 = vector.broadcast %cst_12 : f32 to vector<18x1x96xf32>
    %cst_13 = arith.constant 0.000000e+00 : f32
    %19 = vector.broadcast %cst_13 : f32 to vector<16x16x96xf32>
    %20 = vector.extract_strided_slice %17 {offsets = [0, 0, 0], sizes = [18, 15, 96], strides = [1, 1, 1]} : vector<18x16x96xf32> to vector<18x15x96xf32>
    %21 = tpu.concatenate %18, %20 in 1 : vector<18x1x96xf32>, vector<18x15x96xf32> -> vector<18x16x96xf32>
    %c0_14 = arith.constant 0 : index
    %c0_15 = arith.constant 0 : index
    %22 = vector.load %arg5[%c0_14, %c0_15] : memref<9x96xf32, #tpu.memory_space<vmem>>, vector<1x96xf32>
    %23 = vector.shape_cast %22 : vector<1x96xf32> to vector<96xf32>
    %24 = vector.extract_strided_slice %21 {offsets = [0, 0, 0], sizes = [16, 16, 96], strides = [1, 1, 1]} : vector<18x16x96xf32> to vector<16x16x96xf32>
    %25 = vector.shape_cast %23 : vector<96xf32> to vector<1x1x96xf32>
    %26 = vector.broadcast %25 : vector<1x1x96xf32> to vector<16x16x96xf32>
    %27 = arith.mulf %24, %26 : vector<16x16x96xf32>
    %28 = arith.addf %19, %27 : vector<16x16x96xf32>
    %c3 = arith.constant 3 : index
    %c0_16 = arith.constant 0 : index
    %29 = vector.load %arg5[%c3, %c0_16] : memref<9x96xf32, #tpu.memory_space<vmem>>, vector<1x96xf32>
    %30 = vector.shape_cast %29 : vector<1x96xf32> to vector<96xf32>
    %31 = vector.extract_strided_slice %21 {offsets = [1, 0, 0], sizes = [16, 16, 96], strides = [1, 1, 1]} : vector<18x16x96xf32> to vector<16x16x96xf32>
    %32 = vector.shape_cast %30 : vector<96xf32> to vector<1x1x96xf32>
    %33 = vector.broadcast %32 : vector<1x1x96xf32> to vector<16x16x96xf32>
    %34 = arith.mulf %31, %33 : vector<16x16x96xf32>
    %35 = arith.addf %28, %34 : vector<16x16x96xf32>
    %c6 = arith.constant 6 : index
    %c0_17 = arith.constant 0 : index
    %36 = vector.load %arg5[%c6, %c0_17] : memref<9x96xf32, #tpu.memory_space<vmem>>, vector<1x96xf32>
    %37 = vector.shape_cast %36 : vector<1x96xf32> to vector<96xf32>
    %38 = vector.extract_strided_slice %21 {offsets = [2, 0, 0], sizes = [16, 16, 96], strides = [1, 1, 1]} : vector<18x16x96xf32> to vector<16x16x96xf32>
    %39 = vector.shape_cast %37 : vector<96xf32> to vector<1x1x96xf32>
    %40 = vector.broadcast %39 : vector<1x1x96xf32> to vector<16x16x96xf32>
    %41 = arith.mulf %38, %40 : vector<16x16x96xf32>
    %42 = arith.addf %35, %41 : vector<16x16x96xf32>
    %c1 = arith.constant 1 : index
    %c0_18 = arith.constant 0 : index
    %43 = vector.load %arg5[%c1, %c0_18] : memref<9x96xf32, #tpu.memory_space<vmem>>, vector<1x96xf32>
    %44 = vector.shape_cast %43 : vector<1x96xf32> to vector<96xf32>
    %45 = vector.extract_strided_slice %17 {offsets = [0, 0, 0], sizes = [16, 16, 96], strides = [1, 1, 1]} : vector<18x16x96xf32> to vector<16x16x96xf32>
    %46 = vector.shape_cast %44 : vector<96xf32> to vector<1x1x96xf32>
    %47 = vector.broadcast %46 : vector<1x1x96xf32> to vector<16x16x96xf32>
    %48 = arith.mulf %45, %47 : vector<16x16x96xf32>
    %49 = arith.addf %42, %48 : vector<16x16x96xf32>
    %c4 = arith.constant 4 : index
    %c0_19 = arith.constant 0 : index
    %50 = vector.load %arg5[%c4, %c0_19] : memref<9x96xf32, #tpu.memory_space<vmem>>, vector<1x96xf32>
    %51 = vector.shape_cast %50 : vector<1x96xf32> to vector<96xf32>
    %52 = vector.extract_strided_slice %17 {offsets = [1, 0, 0], sizes = [16, 16, 96], strides = [1, 1, 1]} : vector<18x16x96xf32> to vector<16x16x96xf32>
    %53 = vector.shape_cast %51 : vector<96xf32> to vector<1x1x96xf32>
    %54 = vector.broadcast %53 : vector<1x1x96xf32> to vector<16x16x96xf32>
    %55 = arith.mulf %52, %54 : vector<16x16x96xf32>
    %56 = arith.addf %49, %55 : vector<16x16x96xf32>
    %c7 = arith.constant 7 : index
    %c0_20 = arith.constant 0 : index
    %57 = vector.load %arg5[%c7, %c0_20] : memref<9x96xf32, #tpu.memory_space<vmem>>, vector<1x96xf32>
    %58 = vector.shape_cast %57 : vector<1x96xf32> to vector<96xf32>
    %59 = vector.extract_strided_slice %17 {offsets = [2, 0, 0], sizes = [16, 16, 96], strides = [1, 1, 1]} : vector<18x16x96xf32> to vector<16x16x96xf32>
    %60 = vector.shape_cast %58 : vector<96xf32> to vector<1x1x96xf32>
    %61 = vector.broadcast %60 : vector<1x1x96xf32> to vector<16x16x96xf32>
    %62 = arith.mulf %59, %61 : vector<16x16x96xf32>
    %63 = arith.addf %56, %62 : vector<16x16x96xf32>
    %64 = vector.extract_strided_slice %17 {offsets = [0, 1, 0], sizes = [18, 15, 96], strides = [1, 1, 1]} : vector<18x16x96xf32> to vector<18x15x96xf32>
    %65 = tpu.concatenate %64, %18 in 1 : vector<18x15x96xf32>, vector<18x1x96xf32> -> vector<18x16x96xf32>
    %c2 = arith.constant 2 : index
    %c0_21 = arith.constant 0 : index
    %66 = vector.load %arg5[%c2, %c0_21] : memref<9x96xf32, #tpu.memory_space<vmem>>, vector<1x96xf32>
    %67 = vector.shape_cast %66 : vector<1x96xf32> to vector<96xf32>
    %68 = vector.extract_strided_slice %65 {offsets = [0, 0, 0], sizes = [16, 16, 96], strides = [1, 1, 1]} : vector<18x16x96xf32> to vector<16x16x96xf32>
    %69 = vector.shape_cast %67 : vector<96xf32> to vector<1x1x96xf32>
    %70 = vector.broadcast %69 : vector<1x1x96xf32> to vector<16x16x96xf32>
    %71 = arith.mulf %68, %70 : vector<16x16x96xf32>
    %72 = arith.addf %63, %71 : vector<16x16x96xf32>
    %c5 = arith.constant 5 : index
    %c0_22 = arith.constant 0 : index
    %73 = vector.load %arg5[%c5, %c0_22] : memref<9x96xf32, #tpu.memory_space<vmem>>, vector<1x96xf32>
    %74 = vector.shape_cast %73 : vector<1x96xf32> to vector<96xf32>
    %75 = vector.extract_strided_slice %65 {offsets = [1, 0, 0], sizes = [16, 16, 96], strides = [1, 1, 1]} : vector<18x16x96xf32> to vector<16x16x96xf32>
    %76 = vector.shape_cast %74 : vector<96xf32> to vector<1x1x96xf32>
    %77 = vector.broadcast %76 : vector<1x1x96xf32> to vector<16x16x96xf32>
    %78 = arith.mulf %75, %77 : vector<16x16x96xf32>
    %79 = arith.addf %72, %78 : vector<16x16x96xf32>
    %c8 = arith.constant 8 : index
    %c0_23 = arith.constant 0 : index
    %80 = vector.load %arg5[%c8, %c0_23] : memref<9x96xf32, #tpu.memory_space<vmem>>, vector<1x96xf32>
    %81 = vector.shape_cast %80 : vector<1x96xf32> to vector<96xf32>
    %82 = vector.extract_strided_slice %65 {offsets = [2, 0, 0], sizes = [16, 16, 96], strides = [1, 1, 1]} : vector<18x16x96xf32> to vector<16x16x96xf32>
    %83 = vector.shape_cast %81 : vector<96xf32> to vector<1x1x96xf32>
    %84 = vector.broadcast %83 : vector<1x1x96xf32> to vector<16x16x96xf32>
    %85 = arith.mulf %82, %84 : vector<16x16x96xf32>
    %86 = arith.addf %79, %85 : vector<16x16x96xf32>
    %c0_24 = arith.constant 0 : index
    %c0_25 = arith.constant 0 : index
    %87 = vector.load %arg6[%c0_24, %c0_25] : memref<1x96xf32, #tpu.memory_space<vmem>>, vector<1x96xf32>
    %88 = vector.shape_cast %87 : vector<1x96xf32> to vector<96xf32>
    %89 = vector.shape_cast %88 : vector<96xf32> to vector<1x1x96xf32>
    %90 = vector.broadcast %89 : vector<1x1x96xf32> to vector<16x16x96xf32>
    %91 = arith.mulf %86, %90 : vector<16x16x96xf32>
    %c0_26 = arith.constant 0 : index
    %c0_27 = arith.constant 0 : index
    %92 = vector.load %arg7[%c0_26, %c0_27] : memref<1x96xf32, #tpu.memory_space<vmem>>, vector<1x96xf32>
    %93 = vector.shape_cast %92 : vector<1x96xf32> to vector<96xf32>
    %94 = vector.shape_cast %93 : vector<96xf32> to vector<1x1x96xf32>
    %95 = vector.broadcast %94 : vector<1x1x96xf32> to vector<16x16x96xf32>
    %96 = arith.addf %91, %95 : vector<16x16x96xf32>
    %cst_28 = arith.constant 0.000000e+00 : f32
    %cst_29 = arith.constant 6.000000e+00 : f32
    %97 = vector.broadcast %cst_28 : f32 to vector<16x16x96xf32>
    %98 = arith.maximumf %97, %96 : vector<16x16x96xf32>
    %99 = vector.broadcast %cst_29 : f32 to vector<16x16x96xf32>
    %100 = arith.minimumf %99, %98 : vector<16x16x96xf32>
    %101 = vector.shape_cast %100 : vector<16x16x96xf32> to vector<256x96xf32>
    %102 = arith.truncf %101 : vector<256x96xf32> to vector<256x96xbf16>
    %c0_30 = arith.constant 0 : index
    %c0_31 = arith.constant 0 : index
    %103 = vector.load %arg8[%c0_30, %c0_31] : memref<96x16xbf16, #tpu.memory_space<vmem>>, vector<96x16xbf16>
    %cst_32 = arith.constant dense<0.000000e+00> : vector<256x16xf32>
    %104 = tpu.matmul %102, %103, %cst_32 {dimension_numbers = #tpu.dot_dimension_numbers<[1], [0], [0], [1], [0, 0, 1, 1], [], []>} : vector<256x96xbf16>, vector<96x16xbf16>, vector<256x16xf32> -> vector<256x16xf32>
    %c0_33 = arith.constant 0 : index
    %c0_34 = arith.constant 0 : index
    %105 = vector.load %arg9[%c0_33, %c0_34] : memref<1x16xf32, #tpu.memory_space<vmem>>, vector<1x16xf32>
    %106 = vector.broadcast %105 : vector<1x16xf32> to vector<256x16xf32>
    %107 = arith.mulf %104, %106 : vector<256x16xf32>
    %c0_35 = arith.constant 0 : index
    %c0_36 = arith.constant 0 : index
    %108 = vector.load %arg10[%c0_35, %c0_36] : memref<1x16xf32, #tpu.memory_space<vmem>>, vector<1x16xf32>
    %109 = vector.broadcast %108 : vector<1x16xf32> to vector<256x16xf32>
    %110 = arith.addf %107, %109 : vector<256x16xf32>
    %111 = vector.shape_cast %1 : vector<16x16x16xbf16> to vector<256x16xbf16>
    %112 = arith.extf %111 : vector<256x16xbf16> to vector<256x16xf32>
    %113 = arith.addf %110, %112 : vector<256x16xf32>
    %114 = vector.shape_cast %113 : vector<256x16xf32> to vector<16x16x16xf32>
    %115 = arith.truncf %114 : vector<16x16x16xf32> to vector<16x16x16xbf16>
    %c0_37 = arith.constant 0 : index
    %c0_38 = arith.constant 0 : index
    %c0_39 = arith.constant 0 : index
    %c0_40 = arith.constant 0 : index
    %116 = vector.load %arg11[%c0_37, %c0_38, %c0_39, %c0_40] : memref<1x16x16x16xbf16, #tpu.memory_space<vmem>>, vector<1x16x16x16xbf16>
    %117 = vector.shape_cast %116 : vector<1x16x16x16xbf16> to vector<16x16x16xbf16>
    %118 = vector.shape_cast %115 : vector<16x16x16xbf16> to vector<1x16x16x16xbf16>
    tpu.vector_store %arg11[%c0_37, %c0_38, %c0_39, %c0_40], %118 {strides = array<i32>} : memref<1x16x16x16xbf16, #tpu.memory_space<vmem>>, vector<1x16x16x16xbf16>,
    return
  }
  func.func @transform_0(%arg0: i32) -> (i32, i32, i32, i32) {
    %c0_i32 = arith.constant 0 : i32
    %c0_i32_0 = arith.constant 0 : i32
    %c0_i32_1 = arith.constant 0 : i32
    %c0_i32_2 = arith.constant 0 : i32
    return %arg0, %c0_i32, %c0_i32_0, %c0_i32_1 : i32, i32, i32, i32
  }
  func.func @transform_1(%arg0: i32) -> (i32, i32) {
    %c0_i32 = arith.constant 0 : i32
    %c0_i32_0 = arith.constant 0 : i32
    %c0_i32_1 = arith.constant 0 : i32
    return %c0_i32, %c0_i32_0 : i32, i32
  }
  func.func @transform_2(%arg0: i32) -> (i32, i32) {
    %c0_i32 = arith.constant 0 : i32
    %c0_i32_0 = arith.constant 0 : i32
    %c0_i32_1 = arith.constant 0 : i32
    return %c0_i32, %c0_i32_0 : i32, i32
  }
  func.func @transform_3(%arg0: i32) -> (i32, i32) {
    %c0_i32 = arith.constant 0 : i32
    %c0_i32_0 = arith.constant 0 : i32
    %c0_i32_1 = arith.constant 0 : i32
    return %c0_i32, %c0_i32_0 : i32, i32
  }
  func.func @transform_4(%arg0: i32) -> (i32, i32) {
    %c0_i32 = arith.constant 0 : i32
    %c0_i32_0 = arith.constant 0 : i32
    %c0_i32_1 = arith.constant 0 : i32
    return %c0_i32, %c0_i32_0 : i32, i32
  }
  func.func @transform_5(%arg0: i32) -> (i32, i32) {
    %c0_i32 = arith.constant 0 : i32
    %c0_i32_0 = arith.constant 0 : i32
    %c0_i32_1 = arith.constant 0 : i32
    return %c0_i32, %c0_i32_0 : i32, i32
  }
  func.func @transform_6(%arg0: i32) -> (i32, i32) {
    %c0_i32 = arith.constant 0 : i32
    %c0_i32_0 = arith.constant 0 : i32
    %c0_i32_1 = arith.constant 0 : i32
    return %c0_i32, %c0_i32_0 : i32, i32
  }
  func.func @transform_7(%arg0: i32) -> (i32, i32) {
    %c0_i32 = arith.constant 0 : i32
    %c0_i32_0 = arith.constant 0 : i32
    %c0_i32_1 = arith.constant 0 : i32
    return %c0_i32, %c0_i32_0 : i32, i32
  }
  func.func @transform_8(%arg0: i32) -> (i32, i32) {
    %c0_i32 = arith.constant 0 : i32
    %c0_i32_0 = arith.constant 0 : i32
    %c0_i32_1 = arith.constant 0 : i32
    return %c0_i32, %c0_i32_0 : i32, i32
  }
  func.func @transform_9(%arg0: i32) -> (i32, i32) {
    %c0_i32 = arith.constant 0 : i32
    %c0_i32_0 = arith.constant 0 : i32
    %c0_i32_1 = arith.constant 0 : i32
    return %c0_i32, %c0_i32_0 : i32, i32
  }
  func.func @transform_10(%arg0: i32) -> (i32, i32, i32, i32) {
    %c0_i32 = arith.constant 0 : i32
    %c0_i32_0 = arith.constant 0 : i32
    %c0_i32_1 = arith.constant 0 : i32
    %c0_i32_2 = arith.constant 0 : i32
    return %arg0, %c0_i32, %c0_i32_0, %c0_i32_1 : i32, i32, i32, i32
  }
}

</mosaic_0001>

<bundles_post_ra>
// kernel: inverted_residual_forward.1
= control target key start
LH: loop header
LB: loop body
LE: loop exit
PB: predicated region body
PF: predicated region fallthrough
CT: control target
= control target key end

     0   :  { %s2879_s13 = smov 0   ;;  %s4625_s0 = inlined_call_operand.vmem [shape: bf16[2,16,16,16], index: 0, kind: input, shape index: {}]   ;;  %s4626_s1 = inlined_call_operand.vmem [shape: bf16[16,96], index: 1, kind: input, shape index: {}]   ;;  %s4627_s2 = inlined_call_operand.vmem [shape: f32[1,96], index: 2, kind: input, shape index: {}]   ;;  %s4628_s3 = inlined_call_operand.vmem [shape: f32[1,96], index: 3, kind: input, shape index: {}]   ;;  %s4629_s4 = inlined_call_operand.vmem [shape: f32[9,96], index: 4, kind: input, shape index: {}]   ;;  %s4630_s5 = inlined_call_operand.vmem [shape: f32[1,96], index: 5, kind: input, shape index: {}]   ;;  %s4631_s6 = inlined_call_operand.vmem [shape: f32[1,96], index: 6, kind: input, shape index: {}]   ;;  %s4632_s7 = inlined_call_operand.vmem [shape: bf16[96,16], index: 7, kind: input, shape index: {}]   ;;  %s4633_s8 = inlined_call_operand.vmem [shape: f32[1,16], index: 8, kind: input, shape index: {}]   ;;  %s4634_s9 = inlined_call_operand.vmem [shape: f32[1,16], index: 9, kind: input, shape index: {}]   ;;  %s4635_s10 = inlined_call_operand.vmem [shape: bf16[2,16,16,16], index: 10, kind: output, shape index: {}]  }
   0x1 LB: > { %s2463_s14 = sadd.s32 4294967295, %s2821_s13   ;;  %p2467_p0 = scmp.ge.s32.totalorder %s2821_s13, 1  ;;  %s2821_s13 = sphi %s2879_s13, %s20_s13  }
   0x2   : > { %p312_p1 = scmp.lt.s32.totalorder %s2821_s13, 3 }
   0x4   : > { %p313_p2 = pnand %p2467_p0, %p312_p1 }
   0x6   : > { %316 = sbr.rel (%p313_p2) target bundleno = 710 (0x2c6), region = 60 }
   0xd   : > { %v2748_v0 = vld [vmem:[%s4626_s1] sm:$0xff]   ;;  %p350_p3 = scmp.lt.s32.totalorder %s2463_s14, 1  ;;  %vm481_vm0 = vcmask 130048   ;;  %v2766_v18 = vld [vmem:[%s4632_s7 + $0x8] sm:$0xff]   ;;  %v2767_v19 = vld [vmem:[%s4632_s7 + $0x10] sm:$0xff]   ;;  %v2823_v24 = vmov 0.0  }
   0xe   : > { %2649 = vmatprep.subr.bf16.mxu0 %v2748_v0  ;;  %v2765_v17 = vld [vmem:[%s4632_s7] sm:$0xff]   ;;  %v2768_v20 = vld [vmem:[%s4632_s7 + $0x18] sm:$0xff]   ;;  %v2770_v23 = vld [vmem:[%s4632_s7 + $0x28] sm:$0xff]   ;;  %v2955_v25 = vrot.slane %v2823_v24, 7  ;;  %vm866_vm1 = vcmask 1040384   ;;  %v2963_v30 = vrot.slane %v2823_v24, 1 }
   0xf   : > { %s4906_s14 = smov (!%p350_p3, %s2463_s14), 1  ;;  %2650 = vmatpush3.bf16.msra.mxu0 %v2748_v0  ;;  %2727 = vmatprep.subr.bf16.mxu1 %v2765_v17  ;;  %v2769_v21 = vld [vmem:[%s4632_s7 + $0x20] sm:$0xff]   ;;  %vm1380_vm2 = vcmask 1046528   ;;  %vm1895_vm3 = vcmask 785408   ;;  %vm2375_vm4 = vcmask 125952  }
  0x10   : > { %s2576_s17 = sshll.u32 %s4906_s14, 7  ;;  %2683 = vmatprep.subr.bf16.mxu0 %v2765_v17  ;;  %2733 = vmatpush3.bf16.msra.mxu1 %v2765_v17  ;;  %v2950_v22 = vld [vmem:[%s4627_s2] ss:$0 sm:$0xff]  ;;  %4701 = vst [vmem:[#allocation2_spill] sm:$0xff] %v2955_v25  ;;  %4702 = vst [vmem:[#allocation3_spill] sm:$0xff] %v2963_v30  ;;  %v951_v35 = vsel %vm866_vm1, 0.0, %v2955_v25 }
  0x11   : > { %s2898_s20 = scalar_lea.vmem %s4625_s0, %s2576_s17  ;;  %2728 = vmatprep.subr.bf16.mxu1 %v2766_v18  ;;  %v2960_v27 = vld [vmem:[%s4628_s3] ss:$0 sm:$0xff]  ;;  %v2980_v41 = vld [vmem:[%s4629_s4 + $0x1] ss:$0 sm:$0xff]  ;;  %v2985_v42 = vld [vmem:[%s4629_s4 + $0x6] ss:$0 sm:$0xff]  ;;  %s4485_s25 = scalar_lea.vmem %s4635_s10, %s2576_s17 }
  0x12   : > { %v361_v1 = vld [vmem:[%s2898_s20] sm:$0xff]   ;;  %v363_v2 = vld [vmem:[%s2898_s20 + $0x8] sm:$0xff]   ;;  %v365_v3 = vld [vmem:[%s2898_s20 + $0x10] sm:$0xff]   ;;  %v2990_v44 = vsel %vm1380_vm2, %v2963_v30, 0.0  ;;  %v3004_v49 = vmul.f32 %v2985_v42, %v951_v35  ;;  %v3010_v52 = vmul.f32 0.0, %v2980_v41 }
  0x13   : > { %2651 = vmatprep.mubr.msk.bf16.mxu0 %vm481_vm0, %v361_v1  ;;  %v367_v4 = vld [vmem:[%s2898_s20 + $0x18] sm:$0xff]   ;;  %v369_v5 = vld [vmem:[%s2898_s20 + $0x20] sm:$0xff]   ;;  %v371_v6 = vld [vmem:[%s2898_s20 + $0x28] sm:$0xff]   ;;  %4703 = vst [vmem:[#allocation4_spill] sm:$0xff] %v2990_v44 }
  0x14   : > { %2652 = vmatmul.mubr.msk.bf16.vlgmr.msra.gmra.mrb[0].mxu0 %vm481_vm0, %v363_v2  ;;  %v373_v7 = vld [vmem:[%s2898_s20 + $0x30] sm:$0xff]   ;;  %v375_v8 = vld [vmem:[%s2898_s20 + $0x38] sm:$0xff]   ;;  %v377_v9 = vld [vmem:[%s2898_s20 + $0x40] sm:$0xff]   ;;  %2734 = vmatpush3.bf16.msra.mxu1 %v2766_v18  ;;  %4704 = vst [vmem:[#allocation5_spill] sm:$0xff] %v3004_v49 }
  0x15   : > { %2655 = vmatprep.mubr.msk.bf16.mxu0 %vm481_vm0, %v365_v3  ;;  %v379_v10 = vld [vmem:[%s2898_s20 + $0x48] sm:$0xff]   ;;  %v381_v11 = vld [vmem:[%s2898_s20 + $0x50] sm:$0xff]   ;;  %v383_v12 = vld [vmem:[%s2898_s20 + $0x58] sm:$0xff]   ;;  %2684 = vmatpush3.bf16.msra.mxu0 %v2765_v17 }
  0x16   : > { %v385_v13 = vld [vmem:[%s2898_s20 + $0x60] sm:$0xff]   ;;  %v387_v14 = vld [vmem:[%s2898_s20 + $0x68] sm:$0xff]   ;;  %v389_v15 = vld [vmem:[%s2898_s20 + $0x70] sm:$0xff]   ;;  %2685 = vmatprep.subr.bf16.mxu0 %v2766_v18  ;;  %2729 = vmatprep.subr.bf16.mxu1 %v2767_v19 }
  0x17   : > { %v391_v16 = vld [vmem:[%s2898_s20 + $0x78] sm:$0xff]   ;;  %v2970_v34 = vld [vmem:[%s4629_s4] ss:$0 sm:$0xff]  ;;  %v2995_v45 = vld [vmem:[%s4629_s4 + $0x4] ss:$0 sm:$0xff] }
  0x18   : > { %2735 = vmatpush3.bf16.msra.mxu1 %v2767_v19  ;;  %v3000_v46 = vld [vmem:[%s4629_s4 + $0x7] ss:$0 sm:$0xff]  ;;  %v973_v48 = vmul.f32 %v2970_v34, %v951_v35  ;;  %v3015_v53 = vld [vmem:[%s4629_s4 + $0x2] ss:$0 sm:$0xff]  ;;  %v974_v55 = vmul.f32 %v2970_v34, %v2955_v25  ;;  %v3041_v1 = vld [vmem:[%s4629_s4 + $0x3] ss:$0 sm:$0xff] }
  0x19   : > { %2686 = vmatpush3.bf16.msra.mxu0 %v2766_v18  ;;  %2730 = vmatprep.subr.bf16.mxu1 %v2768_v20  ;;  %v3021_v57 = vmul.f32 %v3015_v53, %v2963_v30  ;;  %v3025_v59 = vmul.f32 %v3015_v53, %v2990_v44 }
  0x1a   : > { %2687 = vmatprep.subr.bf16.mxu0 %v2767_v19 }
  0x1c   : > { %2656 = vmatmul.mubr.msk.bf16.gmra.mrb[4].mxu0 %vm481_vm0, %v367_v4  ;;  %2736 = vmatpush3.bf16.msra.mxu1 %v2768_v20 }
  0x1d   : > { %2659 = vmatprep.mubr.msk.bf16.mxu0 %vm481_vm0, %v369_v5  ;;  %2688 = vmatpush3.bf16.msra.mxu0 %v2767_v19 }
  0x1e   : > { %2689 = vmatprep.subr.bf16.mxu0 %v2768_v20  ;;  %2731 = vmatprep.subr.bf16.mxu1 %v2769_v21 }
  0x20   : > { %2737 = vmatpush3.bf16.msra.mxu1 %v2769_v21 }
  0x21   : > { %2690 = vmatpush3.bf16.msra.mxu0 %v2768_v20  ;;  %2732 = vmatprep.subr.bf16.mxu1 %v2770_v23 }
  0x22   : > { %2691 = vmatprep.subr.bf16.mxu0 %v2769_v21 }
  0x24   : > { %2660 = vmatmul.mubr.msk.bf16.gmra.mrb[8].mxu0 %vm481_vm0, %v371_v6  ;;  %2738 = vmatpush3.bf16.msra.mxu1 %v2770_v23 }
  0x25   : > { %2663 = vmatprep.mubr.msk.bf16.mxu0 %vm481_vm0, %v373_v7  ;;  %2692 = vmatpush3.bf16.msra.mxu0 %v2769_v21 }
  0x26   : > { %2693 = vmatprep.subr.bf16.mxu0 %v2770_v23 }
  0x29   : > { %2694 = vmatpush3.bf16.msra.mxu0 %v2770_v23 }
  0x2c   : > { %2664 = vmatmul.mubr.msk.bf16.gmra.mrb[12].mxu0 %vm481_vm0, %v375_v8 }
  0x2d   : > { %2667 = vmatprep.mubr.msk.bf16.mxu0 %vm481_vm0, %v377_v9 }
  0x34   : > { %2668 = vmatmul.mubr.msk.bf16.gmra.mrb[16].mxu0 %vm481_vm0, %v379_v10 }
  0x35   : > { %2671 = vmatprep.mubr.msk.bf16.mxu0 %vm481_vm0, %v381_v11 }
  0x3c   : > { %2672 = vmatmul.mubr.msk.bf16.gmra.mrb[20].mxu0 %vm481_vm0, %v383_v12 }
  0x3d   : > { %2675 = vmatprep.mubr.msk.bf16.mxu0 %vm481_vm0, %v385_v13 }
  0x44   : > { %2676 = vmatmul.mubr.msk.bf16.gmra.mrb[24].mxu0 %vm481_vm0, %v387_v14 }
  0x45   : > { %2679 = vmatprep.mubr.msk.bf16.mxu0 %vm481_vm0, %v389_v15 }
  0x4c   : > { %2680 = vmatmul.mubr.msk.bf16.gmra.mrb[28].mxu0 %vm481_vm0, %v391_v16 }
  0xe7   : > { %v2653_v26 = vpop.f32.mrb[0].mxu0 }
  0xe8   : > { %v700_v28 = vmul.f32 %v2653_v26, %v2950_v22  ;;  %v564_v29 = vpop.f32.mrb[1].mxu0  ;;  %v3074_v26 = vld [vmem:[%s4629_s4 + $0x5] ss:$0 sm:$0xff] }
  0xe9   : > { %v698_v31 = vmul.f32 %v2950_v22, %v564_v29  ;;  %v2654_v32 = vpop.f32.mrb[2].mxu0 }
  0xea   : > { %v739_v33 = vadd.f32 %v2960_v27, %v700_v28  ;;  %v701_v36 = vmul.f32 %v2654_v32, %v2950_v22  ;;  %v567_v37 = vpop.f32.mrb[3].mxu0 }
  0xeb   : > { %v737_v38 = vadd.f32 %v2960_v27, %v698_v31  ;;  %v699_v39 = vmul.f32 %v2950_v22, %v567_v37 }
  0xec   : > { %v771_v40 = vmax.f32 %v739_v33, 0.0  ;;  %v740_v43 = vadd.f32 %v2960_v27, %v701_v36 }
  0xed   : > { %v769_v47 = vmax.f32 %v737_v38, 0.0  ;;  %v738_v50 = vadd.f32 %v2960_v27, %v699_v39 }
  0xee   : > { %v3007_v51 = vmin.f32 %v771_v40, 6.0  ;;  %v772_v54 = vmax.f32 %v740_v43, 0.0 }
  0xef   : > { %v801_v56 = vmin.f32 %v769_v47, 6.0  ;;  %v770_v58 = vmax.f32 %v738_v50, 0.0  ;;  %v2657_v60 = vpop.f32.mrb[4].mxu0 }
  0xf0   : > { %v872_v61 = vrot.slane %v3007_v51, 7  ;;  %v3030_v62 = vmul.f32 %v2980_v41, %v3007_v51  ;;  %v3034_v63 = vmul.f32 %v2995_v45, %v3007_v51  ;;  %v1317_v0 = vmul.f32 %v3000_v46, %v3007_v51  ;;  %v580_v2 = vpop.f32.mrb[5].mxu0 }
  0xf1   : > { %v869_v4 = vrot.slane %v801_v56, 7  ;;  %v3045_v5 = vmul.f32 %v2980_v41, %v801_v56  ;;  %v1248_v6 = vmul.f32 %v2995_v45, %v801_v56  ;;  %v2658_v7 = vpop.f32.mrb[6].mxu0  ;;  %v1383_v9 = vrot.slane %v801_v56, 1 }
  0xf2   : > { %4705 = vst [vmem:[#allocation6_spill] sm:$0xff] %v3030_v62  ;;  %v953_v8 = vsel %vm866_vm1, 0.0, %v872_v61  ;;  %v3049_v10 = vmin.f32 %v772_v54, 6.0  ;;  %v802_v11 = vmin.f32 %v770_v58, 6.0  ;;  %v583_v12 = vpop.f32.mrb[7].mxu0 }
  0xf3   : > { %v3052_v13 = vmul.f32 %v2970_v34, %v953_v8  ;;  %v952_v14 = vsel %vm866_vm1, 0.0, %v869_v4  ;;  %v1044_v15 = vmul.f32 %v3041_v1, %v953_v8  ;;  %v1111_v16 = vmul.f32 %v2985_v42, %v953_v8 }
  0xf4   : > { %v975_v17 = vmul.f32 %v2970_v34, %v952_v14  ;;  %v1042_v18 = vmul.f32 %v3041_v1, %v952_v14  ;;  %v873_v19 = vrot.slane %v3049_v10, 7  ;;  %v3062_v20 = vmul.f32 %v2980_v41, %v3049_v10 }
  0xf5   : > { %v3066_v21 = vmul.f32 %v2995_v45, %v3049_v10  ;;  %v1318_v23 = vmul.f32 %v3000_v46, %v3049_v10  ;;  %v4636_v24 = vrot.slane %v3049_v10, 1  ;;  %v870_v28 = vrot.slane %v802_v11, 7 }
  0xf6   : > { %4706 = vst [vmem:[#allocation7_spill] sm:$0xff] %v3062_v20  ;;  %v1074_v29 = vadd.f32 %v1042_v18, %v973_v48  ;;  %v3076_v31 = vadd.f32 %v1044_v15, %v975_v17  ;;  %v874_v32 = vsel %vm866_vm1, %v872_v61, %v873_v19  ;;  %v3080_v33 = vmul.f32 %v2980_v41, %v802_v11 }
  0xf7   : > { %v3083_v35 = vmul.f32 %v2970_v34, %v874_v32  ;;  %v3088_v36 = vsel %vm1380_vm2, %v4636_v24, 0.0  ;;  %v871_v37 = vsel %vm866_vm1, %v869_v4, %v870_v28  ;;  %v1045_v38 = vmul.f32 %v3041_v1, %v874_v32  ;;  %v2661_v39 = vpop.f32.mrb[8].mxu0 }
  0xf8   : > { %4708 = vst [vmem:[#allocation9_spill] sm:$0xff] %v3088_v36  ;;  %v1143_v40 = vadd.f32 %v1111_v16, %v1074_v29  ;;  %v3094_v43 = vmul.f32 %v3074_v26, %v3088_v36  ;;  %v976_v47 = vmul.f32 %v2970_v34, %v871_v37  ;;  %v1043_v48 = vmul.f32 %v3041_v1, %v871_v37  ;;  %v596_v50 = vpop.f32.mrb[9].mxu0 }
  0xf9   : > { %4707 = vst [vmem:[#allocation8_spill] sm:$0xff] %v3083_v35  ;;  %v1112_v54 = vmul.f32 %v2985_v42, %v874_v32  ;;  %v1249_v56 = vmul.f32 %v2995_v45, %v802_v11  ;;  %v1384_v58 = vrot.slane %v802_v11, 1  ;;  %v704_v61 = vmul.f32 %v2657_v60, %v2950_v22  ;;  %v3101_v4 = vpop.f32.mrb[10].mxu0 }
  0xfa   : > { %v1211_v8 = vadd.f32 %v3010_v52, %v1143_v40  ;;  %v1075_v14 = vadd.f32 %v1043_v48, %v974_v55  ;;  %v3104_v15 = vadd.f32 %v1045_v38, %v976_v47  ;;  %v702_v16 = vmul.f32 %v2950_v22, %v580_v2  ;;  %v3107_v17 = vpop.f32.mrb[11].mxu0 }
  0xfb   : > { %v1385_v18 = vsel %vm1380_vm2, %v1383_v9, %v1384_v58  ;;  %v1466_v19 = vsel %vm1380_vm2, %v1384_v58, 0.0  ;;  %v743_v28 = vadd.f32 %v2960_v27, %v704_v61  ;;  %v705_v11 = vmul.f32 %v2658_v7, %v2950_v22 }
  0xfc   : > { %v1280_v60 = vadd.f32 %v1248_v6, %v1211_v8  ;;  %v1144_v29 = vadd.f32 %v1112_v54, %v1075_v14  ;;  %v3114_v32 = vmul.f32 %v3015_v53, %v1385_v18  ;;  %v3117_v55 = vmul.f32 %v3015_v53, %v1466_v19 }
  0xfd   : > { %v3120_v2 = vmul.f32 %v3074_v26, %v1385_v18  ;;  %v3123_v37 = vmul.f32 %v3074_v26, %v1466_v19  ;;  %v775_v9 = vmax.f32 %v743_v28, 0.0  ;;  %v741_v38 = vadd.f32 %v2960_v27, %v702_v16 }
  0xfe   : > { %v1348_v40 = vadd.f32 %v1317_v0, %v1280_v60  ;;  %v1212_v7 = vadd.f32 %v3010_v52, %v1144_v29  ;;  %v744_v6 = vadd.f32 %v2960_v27, %v705_v11  ;;  %v703_v47 = vmul.f32 %v2950_v22, %v583_v12 }
  0xff   : > { %4709 = vst [vmem:[#allocation10_spill] sm:$0xff] %v3120_v2  ;;  %4710 = vst [vmem:[#allocation11_spill] sm:$0xff] %v3123_v37  ;;  %v3129_v48 = vmin.f32 %v775_v9, 6.0  ;;  %v773_v54 = vmax.f32 %v741_v38, 0.0  ;;  %v708_v58 = vmul.f32 %v2661_v39, %v2950_v22  ;;  %v706_v61 = vmul.f32 %v2950_v22, %v596_v50  ;;  %v3133_v8 = vpop.f32.mrb[12].mxu0 }
 0x100   : > { %v3136_v14 = vadd.f32 %v3021_v57, %v1348_v40  ;;  %v1281_v16 = vadd.f32 %v1249_v56, %v1212_v7  ;;  %v776_v0 = vmax.f32 %v744_v6, 0.0  ;;  %v742_v52 = vadd.f32 %v2960_v27, %v703_v47  ;;  %v3139_v18 = vpop.f32.mrb[13].mxu0 }
 0x101   : > { %4711 = vst [vmem:[#allocation12_spill] sm:$0xff] %v3129_v48  ;;  %v878_v12 = vrot.slane %v3129_v48, 7  ;;  %v3144_v19 = vmul.f32 %v2980_v41, %v3129_v48  ;;  %v3148_v39 = vmul.f32 %v2995_v45, %v3129_v48  ;;  %v3152_v57 = vmul.f32 %v3000_v46, %v3129_v48  ;;  %v3154_v50 = vpop.f32.mrb[14].mxu0 }
 0x102   : > { %v1349_v56 = vadd.f32 %v1318_v23, %v1281_v16  ;;  %v805_v11 = vmin.f32 %v773_v54, 6.0  ;;  %v3157_v60 = vmin.f32 %v776_v0, 6.0  ;;  %v3159_v29 = vpop.f32.mrb[15].mxu0  ;;  %v774_v38 = vmax.f32 %v742_v52, 0.0 }
 0x103   : > { %4712 = vst [vmem:[#allocation13_spill] sm:$0xff] %v3152_v57  ;;  %v955_v9 = vsel %vm866_vm1, 0.0, %v878_v12  ;;  %v747_v40 = vadd.f32 %v2960_v27, %v708_v58  ;;  %v3164_v7 = vadd.f32 %v2960_v27, %v706_v61 }
 0x104   : > { %4713 = vst [vmem:[#allocation14_spill] sm:$0xff] %v3157_v60  ;;  %v3167_v6 = vadd.f32 %v3025_v59, %v1349_v56  ;;  %v3170_v23 = vmul.f32 %v2970_v34, %v955_v9  ;;  %v1048_v47 = vmul.f32 %v3041_v1, %v955_v9  ;;  %v3174_v54 = vmul.f32 %v2985_v42, %v955_v9 }
 0x105   : > { %v875_v16 = vrot.slane %v805_v11, 7  ;;  %v3177_v0 = vmul.f32 %v2980_v41, %v805_v11  ;;  %v3180_v58 = vmul.f32 %v2995_v45, %v805_v11  ;;  %v1319_v61 = vmul.f32 %v3000_v46, %v805_v11 }
 0x106   : > { %4714 = vst [vmem:[#allocation15_spill] sm:$0xff] %v3167_v6  ;;  %4715 = vst [vmem:[#allocation16_spill] sm:$0xff] %v3174_v54  ;;  %v1389_v52 = vrot.slane %v805_v11, 1  ;;  %v879_v59 = vrot.slane %v3157_v60, 7  ;;  %v3186_v56 = vmul.f32 %v2980_v41, %v3157_v60  ;;  %v3190_v9 = vmul.f32 %v2995_v45, %v3157_v60 }
 0x107   : > { %4716 = vst [vmem:[#allocation17_spill] sm:$0xff] %v3180_v58  ;;  %v954_v28 = vsel %vm866_vm1, 0.0, %v875_v16  ;;  %v3195_v3 = vmul.f32 %v3000_v46, %v3157_v60  ;;  %v806_v24 = vmin.f32 %v774_v38, 6.0  ;;  %v779_v44 = vmax.f32 %v747_v40, 0.0  ;;  %v3197_v30 = vpop.f32.mrb[16].mxu0 }
 0x108   : > { %v979_v11 = vmul.f32 %v2970_v34, %v954_v28  ;;  %v1046_v49 = vmul.f32 %v3041_v1, %v954_v28  ;;  %v1113_v25 = vmul.f32 %v2985_v42, %v954_v28  ;;  %v3203_v57 = vsel %vm866_vm1, %v878_v12, %v879_v59  ;;  %v3205_v48 = vpop.f32.mrb[17].mxu0 }
 0x109   : > { %4717 = vst [vmem:[#allocation18_spill] sm:$0xff] %v3195_v3  ;;  %4718 = vst [vmem:[#allocation19_spill] sm:$0xff] %v3203_v57  ;;  %v3209_v58 = vmul.f32 %v2970_v34, %v3203_v57  ;;  %v1049_v38 = vmul.f32 %v3041_v1, %v3203_v57  ;;  %v876_v40 = vrot.slane %v806_v24, 7  ;;  %v3214_v3 = vmul.f32 %v2980_v41, %v806_v24  ;;  %v3216_v20 = vpop.f32.mrb[18].mxu0 }
 0x10a   : > { %v3219_v28 = vadd.f32 %v1046_v49, %v3052_v13  ;;  %v3221_v12 = vadd.f32 %v1048_v47, %v979_v11  ;;  %v1145_v59 = vadd.f32 %v1113_v25, %v3076_v31  ;;  %v3225_v60 = vmul.f32 %v2995_v45, %v806_v24  ;;  %v3227_v62 = vpop.f32.mrb[19].mxu0 }
 0x10b   : > { %v877_v54 = vsel %vm866_vm1, %v875_v16, %v876_v40  ;;  %v1320_v57 = vmul.f32 %v3000_v46, %v806_v24  ;;  %v1390_v35 = vrot.slane %v806_v24, 1  ;;  %v3231_v36 = vmin.f32 %v779_v44, 6.0 }
 0x10c   : > { %4719 = vst [vmem:[#allocation20_spill] sm:$0xff] %v3219_v28  ;;  %4720 = vst [vmem:[#allocation21_spill] sm:$0xff] %v3225_v60  ;;  %v1213_v37 = vadd.f32 %v3045_v5, %v1145_v59  ;;  %v980_v49 = vmul.f32 %v2970_v34, %v877_v54  ;;  %v3236_v13 = vmul.f32 %v3041_v1, %v877_v54  ;;  %v777_v60 = vmax.f32 %v3164_v7, 0.0 }
 0x10d   : > { %4721 = vst [vmem:[#allocation22_spill] sm:$0xff] %v3231_v36  ;;  %v1114_v25 = vmul.f32 %v2985_v42, %v877_v54  ;;  %v3240_v31 = vsel %vm1380_vm2, %v1389_v52, %v1390_v35  ;;  %v3243_v47 = vsel %vm1380_vm2, %v1390_v35, 0.0  ;;  %v4646_v16 = vrot.slane %v3231_v36, 7  ;;  %v3261_v35 = vld [vmem:[%s4629_s4 + $0x8] ss:$0 sm:$0xff] }
 0x10e   : > { %4722 = vst [vmem:[#allocation23_spill] sm:$0xff] %v3236_v13  ;;  %4723 = vst [vmem:[#allocation24_spill] sm:$0xff] %v3240_v31  ;;  %v3248_v44 = vmul.f32 %v2980_v41, %v3231_v36  ;;  %v1282_v5 = vadd.f32 %v3034_v63, %v1213_v37  ;;  %v3251_v24 = vadd.f32 %v1049_v38, %v980_v49 }
 0x10f   : > { %4724 = vst [vmem:[#allocation25_spill] sm:$0xff] %v3243_v47  ;;  %v1146_v11 = vadd.f32 %v1114_v25, %v3104_v15  ;;  %v3256_v54 = vmul.f32 %v3015_v53, %v3243_v47  ;;  %4726 = vst [vmem:[#allocation27_spill] sm:$0xff] %v3261_v35  ;;  %v3265_v52 = vmul.f32 %v3261_v35, %v3240_v31  ;;  %v957_v15 = vsel %vm866_vm1, 0.0, %v4646_v16  ;;  %v3276_v38 = vpop.f32.mrb[20].mxu0 }
 0x110   : > { %v1628_v63 = vmul.f32 %v3261_v35, %v3243_v47  ;;  %v3274_v37 = vmul.f32 %v2995_v45, %v3231_v36  ;;  %v1350_v40 = vadd.f32 %v1319_v61, %v1282_v5  ;;  %v3280_v49 = vmul.f32 %v2970_v34, %v957_v15 }
 0x111   : > { %4725 = vst [vmem:[#allocation26_spill] sm:$0xff] %v3256_v54  ;;  %4727 = vst [vmem:[#allocation28_spill] sm:$0xff] %v3265_v52  ;;  %v1214_v59 = vadd.f32 %v3080_v33, %v1146_v11  ;;  %v1052_v25 = vmul.f32 %v3041_v1, %v957_v15  ;;  %v3283_v54 = vpop.f32.mrb[21].mxu0  ;;  %v1119_v47 = vmul.f32 %v2985_v42, %v957_v15 }
 0x112   : > { %v3288_v16 = vmul.f32 %v3000_v46, %v3231_v36  ;;  %v3292_v61 = vpop.f32.mrb[22].mxu0  ;;  %v3295_v33 = vadd.f32 %v3114_v32, %v1350_v40  ;;  %v709_v11 = vmul.f32 %v3101_v4, %v2950_v22  ;;  %v707_v15 = vmul.f32 %v2950_v22, %v3107_v17 }
 0x113   : > { %v1283_v5 = vadd.f32 %v3066_v21, %v1214_v59  ;;  %v3302_v28 = vpop.f32.mrb[23].mxu0  ;;  %v712_v7 = vmul.f32 %v3133_v8, %v2950_v22  ;;  %v710_v31 = vmul.f32 %v2950_v22, %v3139_v18  ;;  %v713_v32 = vmul.f32 %v3154_v50, %v2950_v22 }
 0x114   : > { %4728 = vst [vmem:[#allocation29_spill] sm:$0xff] %v3288_v16  ;;  %4729 = vst [vmem:[#allocation30_spill] sm:$0xff] %v3295_v33  ;;  %v3304_v16 = vmin.f32 %v777_v60, 6.0  ;;  %v748_v40 = vadd.f32 %v2960_v27, %v709_v11  ;;  %v746_v4 = vadd.f32 %v2960_v27, %v707_v15  ;;  %v3316_v17 = vmul.f32 %v2950_v22, %v3159_v29 }
 0x115   : > { %v1351_v21 = vadd.f32 %v1320_v57, %v1283_v5  ;;  %v751_v15 = vadd.f32 %v2960_v27, %v712_v7  ;;  %v749_v13 = vadd.f32 %v2960_v27, %v710_v31  ;;  %v3333_v52 = vadd.f32 %v2960_v27, %v713_v32 }
 0x116   : > { %4730 = vst [vmem:[#allocation31_spill] sm:$0xff] %v3304_v16  ;;  %v881_v60 = vrot.slane %v3304_v16, 7  ;;  %v3321_v8 = vmul.f32 %v2980_v41, %v3304_v16  ;;  %v1256_v18 = vmul.f32 %v2995_v45, %v3304_v16  ;;  %v1323_v57 = vmul.f32 %v3000_v46, %v3304_v16 }
 0x117   : > { %v1522_v50 = vadd.f32 %v3117_v55, %v1351_v21  ;;  %v780_v5 = vmax.f32 %v748_v40, 0.0  ;;  %v778_v11 = vmax.f32 %v746_v4, 0.0  ;;  %v3335_v35 = vpop.f32.mrb[24].mxu0  ;;  %v783_v31 = vmax.f32 %v751_v15, 0.0 }
 0x118   : > { %v956_v29 = vsel %vm866_vm1, 0.0, %v881_v60  ;;  %4731 = vst [vmem:[#allocation32_spill] sm:$0xff] %v3335_v35  ;;  %v3341_v40 = vpop.f32.mrb[25].mxu0  ;;  %v781_v59 = vmax.f32 %v749_v13, 0.0 }
 0x119   : > { %v1591_v33 = vadd.f32 %v3094_v43, %v1522_v50  ;;  %v983_v6 = vmul.f32 %v2970_v34, %v956_v29  ;;  %v1050_v55 = vmul.f32 %v3041_v1, %v956_v29  ;;  %v1117_v21 = vmul.f32 %v2985_v42, %v956_v29  ;;  %v3347_v32 = vpop.f32.mrb[26].mxu0 }
 0x11a   : > { %v3343_v4 = vmin.f32 %v780_v5, 6.0  ;;  %v3345_v7 = vmin.f32 %v778_v11, 6.0  ;;  %4734 = vst [vmem:[#allocation35_spill] sm:$0xff] %v3347_v32  ;;  %v3355_v2 = vpop.f32.mrb[27].mxu0 }
 0x11b   : > { %v3349_v16 = vadd.f32 %v1628_v63, %v1591_v33  ;;  %v1082_v43 = vadd.f32 %v1050_v55, %v3170_v23  ;;  %v3352_v50 = vadd.f32 %v1052_v25, %v983_v6  ;;  %v1149_v35 = vadd.f32 %v1117_v21, %v3221_v12  ;;  %4735 = vst [vmem:[#allocation36_spill] sm:$0xff] %v3355_v2 }
 0x11c   : > { %4732 = vst [vmem:[#allocation33_spill] sm:$0xff] %v3343_v4  ;;  %4733 = vst [vmem:[#allocation34_spill] sm:$0xff] %v3345_v7  ;;  %v885_v29 = vrot.slane %v3343_v4, 7  ;;  %v3360_v5 = vmul.f32 %v2980_v41, %v3343_v4  ;;  %v3364_v13 = vmul.f32 %v2995_v45, %v3343_v4  ;;  %v3368_v63 = vmul.f32 %v3000_v46, %v3343_v4 }
 0x11d   : > { %v1151_v6 = vadd.f32 %v1119_v47, %v1082_v43  ;;  %v1217_v23 = vadd.f32 %v3177_v0, %v1149_v35  ;;  %v4653_v12 = vrot.slane %v3343_v4, 1  ;;  %v882_v25 = vrot.slane %v3345_v7, 7 }
 0x11e   : > { %4736 = vst [vmem:[#allocation37_spill] sm:$0xff] %v3368_v63  ;;  %v4737_v33 = vrot.slane %v3231_v36, 7  ;;  %v3378_v15 = vmul.f32 %v2980_v41, %v3345_v7  ;;  %v1257_v55 = vmul.f32 %v2995_v45, %v3345_v7  ;;  %v1324_v47 = vmul.f32 %v3000_v46, %v3345_v7 }
 0x11f   : > { %v1219_v0 = vadd.f32 %v3144_v19, %v1151_v6  ;;  %v1286_v35 = vadd.f32 %v3148_v39, %v1217_v23  ;;  %v883_v36 = vsel %vm866_vm1, %v881_v60, %v882_v25  ;;  %v4657_v63 = vrot.slane %v3345_v7, 1  ;;  %v3398_v2 = vpop.f32.mrb[28].mxu0 }
 0x120   : > { %v886_v11 = vsel %vm866_vm1, %v4737_v33, %v885_v29  ;;  %v3394_v33 = vsel %vm1380_vm2, %v4653_v12, 0.0  ;;  %4739 = vst [vmem:[#allocation39_spill] sm:$0xff] %v3398_v2  ;;  %v984_v23 = vmul.f32 %v2970_v34, %v883_v36  ;;  %v1051_v12 = vmul.f32 %v3041_v1, %v883_v36 }
 0x121   : > { %v3387_v21 = vmul.f32 %v2970_v34, %v886_v11  ;;  %v1053_v43 = vmul.f32 %v3041_v1, %v886_v11  ;;  %v1120_v29 = vmul.f32 %v2985_v42, %v886_v11  ;;  %4738 = vst [vmem:[#allocation38_spill] sm:$0xff] %v3394_v33  ;;  %v3400_v19 = vadd.f32 %v1256_v18, %v1219_v0  ;;  %v3409_v11 = vpop.f32.mrb[29].mxu0 }
 0x122   : > { %v3402_v39 = vadd.f32 %v1323_v57, %v1286_v35  ;;  %v3406_v6 = vmul.f32 %v3015_v53, %v3394_v33  ;;  %4743 = vst [vmem:[#allocation43_spill] sm:$0xff] %v3409_v11  ;;  %v1118_v60 = vmul.f32 %v2985_v42, %v883_v36  ;;  %v3416_v25 = vsel %vm1380_vm2, %v4657_v63, 0.0  ;;  %v3420_v57 = vpop.f32.mrb[30].mxu0 }
 0x123   : > { %4740 = vst [vmem:[#allocation40_spill] sm:$0xff] %v3400_v19  ;;  %4744 = vst [vmem:[#allocation44_spill] sm:$0xff] %v3416_v25  ;;  %v3418_v18 = vmin.f32 %v783_v31, 6.0  ;;  %v3422_v0 = vadd.f32 %v1053_v43, %v984_v23  ;;  %v3426_v35 = vmul.f32 %v3015_v53, %v3416_v25  ;;  %v784_v33 = vmax.f32 %v3333_v52, 0.0  ;;  %v3431_v36 = vpop.f32.mrb[31].mxu0 }
 0x124   : > { %4741 = vst [vmem:[#allocation41_spill] sm:$0xff] %v3402_v39  ;;  %4742 = vst [vmem:[#allocation42_spill] sm:$0xff] %v3406_v6  ;;  %v3428_v6 = vmin.f32 %v781_v59, 6.0  ;;  %v1083_v4 = vadd.f32 %v1051_v12, %v3209_v58  ;;  %v1150_v63 = vadd.f32 %v1118_v60, %v3251_v24  ;;  %v716_v19 = vmul.f32 %v3197_v30, %v2950_v22 }
 0x125   : > { %4745 = vst [vmem:[#allocation45_spill] sm:$0xff] %v3418_v18  ;;  %4746 = vst [vmem:[#allocation46_spill] sm:$0xff] %v3420_v57  ;;  %v890_v31 = vrot.slane %v3418_v18, 7  ;;  %v3438_v43 = vmul.f32 %v2980_v41, %v3418_v18  ;;  %v3442_v23 = vmul.f32 %v2995_v45, %v3418_v18  ;;  %v1329_v59 = vmul.f32 %v3000_v46, %v3418_v18 }
 0x126   : > { %4747 = vst [vmem:[#allocation47_spill] sm:$0xff] %v3426_v35  ;;  %4748 = vst [vmem:[#allocation48_spill] sm:$0xff] %v3428_v6  ;;  %v887_v35 = vrot.slane %v3428_v6, 7  ;;  %v1152_v58 = vadd.f32 %v1120_v29, %v1083_v4  ;;  %v1218_v24 = vadd.f32 %v3214_v3, %v1150_v63  ;;  %v3452_v60 = vmul.f32 %v2980_v41, %v3428_v6 }
 0x127   : > { %4749 = vst [vmem:[#allocation49_spill] sm:$0xff] %v3431_v36  ;;  %v959_v12 = vsel %vm866_vm1, 0.0, %v890_v31  ;;  %v1260_v39 = vmul.f32 %v2995_v45, %v3428_v6  ;;  %v1327_v7 = vmul.f32 %v3000_v46, %v3428_v6 }
 0x128   : > { %v3455_v36 = vmul.f32 %v2970_v34, %v959_v12  ;;  %v1056_v57 = vmul.f32 %v3041_v1, %v959_v12  ;;  %v1123_v25 = vmul.f32 %v2985_v42, %v959_v12  ;;  %v958_v52 = vsel %vm866_vm1, 0.0, %v887_v35 }
 0x129   : > { %v1220_v18 = vadd.f32 %v3186_v56, %v1152_v58  ;;  %v1287_v4 = vadd.f32 %v3190_v9, %v1218_v24  ;;  %v987_v3 = vmul.f32 %v2970_v34, %v958_v52  ;;  %v1054_v63 = vmul.f32 %v3041_v1, %v958_v52 }
 0x12a   : > { %v1121_v29 = vmul.f32 %v2985_v42, %v958_v52  ;;  %v3478_v24 = vmin.f32 %v784_v33, 6.0  ;;  %v750_v52 = vadd.f32 %v2960_v27, %v3316_v17 }
 0x12b   : > { %v3470_v11 = vadd.f32 %v1257_v55, %v1220_v18  ;;  %v3472_v2 = vadd.f32 %v1324_v47, %v1287_v4  ;;  %v1086_v56 = vadd.f32 %v1054_v63, %v3280_v49  ;;  %v3475_v9 = vadd.f32 %v1056_v57, %v987_v3 }
 0x12c   : > { %v1153_v58 = vadd.f32 %v1121_v29, %v3352_v50  ;;  %4751 = vst [vmem:[#allocation51_spill] sm:$0xff] %v3478_v24  ;;  %v714_v55 = vmul.f32 %v2950_v22, %v3205_v48  ;;  %v717_v47 = vmul.f32 %v3216_v20, %v2950_v22  ;;  %v715_v49 = vmul.f32 %v2950_v22, %v3227_v62 }
 0x12d   : > { %4750 = vst [vmem:[#allocation50_spill] sm:$0xff] %v3472_v2  ;;  %v1155_v32 = vadd.f32 %v1123_v25, %v1086_v56  ;;  %v891_v33 = vrot.slane %v3478_v24, 7  ;;  %v3494_v17 = vmul.f32 %v2980_v41, %v3478_v24  ;;  %v3498_v30 = vmul.f32 %v2995_v45, %v3478_v24 }
 0x12e   : > { %v1221_v50 = vadd.f32 %v3321_v8, %v1153_v58  ;;  %v3503_v20 = vmul.f32 %v3000_v46, %v3478_v24  ;;  %v4662_v62 = vrot.slane %v3478_v24, 1  ;;  %v782_v25 = vmax.f32 %v750_v52, 0.0 }
 0x12f   : > { %v1223_v48 = vadd.f32 %v3248_v44, %v1155_v32  ;;  %v892_v18 = vsel %vm866_vm1, %v890_v31, %v891_v33  ;;  %v755_v57 = vadd.f32 %v2960_v27, %v716_v19  ;;  %v753_v4 = vadd.f32 %v2960_v27, %v714_v55 }
 0x130   : > { %v1290_v8 = vadd.f32 %v3274_v37, %v1221_v50  ;;  %v3511_v63 = vmul.f32 %v2970_v34, %v892_v18  ;;  %v1057_v44 = vmul.f32 %v3041_v1, %v892_v18  ;;  %v1124_v32 = vmul.f32 %v2985_v42, %v892_v18 }
 0x131   : > { %v1292_v3 = vadd.f32 %v1260_v39, %v1223_v48  ;;  %v3520_v37 = vsel %vm1380_vm2, %v4662_v62, 0.0  ;;  %v3522_v31 = vmin.f32 %v782_v25, 6.0  ;;  %v787_v19 = vmax.f32 %v755_v57, 0.0 }
 0x132   : > { %v3515_v29 = vadd.f32 %v1327_v7, %v1290_v8  ;;  %4753 = vst [vmem:[#allocation53_spill] sm:$0xff] %v3520_v37  ;;  %v3528_v39 = vmul.f32 %v3015_v53, %v3520_v37  ;;  %v785_v58 = vmax.f32 %v753_v4, 0.0  ;;  %v756_v52 = vadd.f32 %v2960_v27, %v717_v47 }
 0x133   : > { %4754 = vst [vmem:[#allocation54_spill] sm:$0xff] %v3522_v31  ;;  %v3524_v56 = vadd.f32 %v1329_v59, %v1292_v3  ;;  %v888_v7 = vrot.slane %v3522_v31, 7  ;;  %v3534_v55 = vmul.f32 %v2980_v41, %v3522_v31  ;;  %v1261_v50 = vmul.f32 %v2995_v45, %v3522_v31 }
 0x134   : > { %4752 = vst [vmem:[#allocation52_spill] sm:$0xff] %v3515_v29  ;;  %4756 = vst [vmem:[#allocation56_spill] sm:$0xff] %v3528_v39  ;;  %v1328_v59 = vmul.f32 %v3000_v46, %v3522_v31  ;;  %v4663_v33 = vrot.slane %v3522_v31, 1  ;;  %v3541_v48 = vmin.f32 %v787_v19, 6.0  ;;  %v3543_v25 = vmin.f32 %v785_v58, 6.0 }
 0x135   : > { %4755 = vst [vmem:[#allocation55_spill] sm:$0xff] %v3524_v56  ;;  %v788_v8 = vmax.f32 %v756_v52, 0.0  ;;  %v889_v47 = vsel %vm866_vm1, %v887_v35, %v888_v7  ;;  %v754_v18 = vadd.f32 %v2960_v27, %v715_v49  ;;  %v720_v57 = vmul.f32 %v3276_v38, %v2950_v22 }
 0x136   : > { %4757 = vst [vmem:[#allocation57_spill] sm:$0xff] %v3541_v48  ;;  %v3551_v4 = vmul.f32 %v2950_v22, %v3283_v54  ;;  %v988_v3 = vmul.f32 %v2970_v34, %v889_v47  ;;  %v1055_v62 = vmul.f32 %v3041_v1, %v889_v47  ;;  %v1122_v19 = vmul.f32 %v2985_v42, %v889_v47 }
 0x137   : > { %v3559_v58 = vsel %vm1380_vm2, %v4663_v33, 0.0  ;;  %v896_v38 = vrot.slane %v3541_v48, 7  ;;  %v3568_v54 = vmul.f32 %v2980_v41, %v3541_v48  ;;  %v3572_v49 = vmul.f32 %v2995_v45, %v3541_v48 }
 0x138   : > { %4758 = vst [vmem:[#allocation58_spill] sm:$0xff] %v3559_v58  ;;  %v3563_v35 = vmul.f32 %v3015_v53, %v3559_v58  ;;  %v1087_v52 = vadd.f32 %v1055_v62, %v3387_v21  ;;  %v3575_v7 = vadd.f32 %v1057_v44, %v988_v3  ;;  %v1154_v47 = vadd.f32 %v1122_v19, %v3422_v0 }
 0x139   : > { %v1333_v12 = vmul.f32 %v3000_v46, %v3541_v48  ;;  %v961_v33 = vsel %vm866_vm1, 0.0, %v896_v38  ;;  %v3585_v37 = vmul.f32 %v2980_v41, %v3543_v25  ;;  %v1264_v19 = vmul.f32 %v2995_v45, %v3543_v25 }
 0x13a   : > { %4759 = vst [vmem:[#allocation59_spill] sm:$0xff] %v3563_v35  ;;  %v893_v35 = vrot.slane %v3543_v25, 7  ;;  %v1156_v56 = vadd.f32 %v1124_v32, %v1087_v52  ;;  %v1222_v21 = vadd.f32 %v3378_v15, %v1154_v47  ;;  %v3589_v62 = vmul.f32 %v2970_v34, %v961_v33 }
 0x13b   : > { %v1060_v0 = vmul.f32 %v3041_v1, %v961_v33  ;;  %v1127_v44 = vmul.f32 %v2985_v42, %v961_v33  ;;  %v1331_v39 = vmul.f32 %v3000_v46, %v3543_v25  ;;  %v3604_v24 = vmin.f32 %v788_v8, 6.0 }
 0x13c   : > { %v960_v3 = vsel %vm866_vm1, 0.0, %v893_v35  ;;  %v1224_v48 = vadd.f32 %v3360_v5, %v1156_v56  ;;  %v1291_v32 = vadd.f32 %v3364_v13, %v1222_v21  ;;  %v786_v58 = vmax.f32 %v754_v18, 0.0 }
 0x13d   : > { %v991_v15 = vmul.f32 %v2970_v34, %v960_v3  ;;  %v1058_v52 = vmul.f32 %v3041_v1, %v960_v3  ;;  %v1125_v47 = vmul.f32 %v2985_v42, %v960_v3  ;;  %4760 = vst [vmem:[#allocation60_spill] sm:$0xff] %v3604_v24  ;;  %v897_v13 = vrot.slane %v3604_v24, 7 }
 0x13e   : > { %v1293_v29 = vadd.f32 %v1261_v50, %v1224_v48  ;;  %v3606_v6 = vadd.f32 %v1328_v59, %v1291_v32  ;;  %v3615_v56 = vmul.f32 %v2980_v41, %v3604_v24  ;;  %v3619_v8 = vmul.f32 %v2995_v45, %v3604_v24 }
 0x13f   : > { %v1090_v31 = vadd.f32 %v1058_v52, %v3455_v36  ;;  %v3609_v2 = vadd.f32 %v1060_v0, %v991_v15  ;;  %v1157_v5 = vadd.f32 %v1125_v47, %v3475_v9  ;;  %v1334_v36 = vmul.f32 %v3000_v46, %v3604_v24 }
 0x140   : > { %v3622_v50 = vadd.f32 %v3503_v20, %v1293_v29  ;;  %v4672_v48 = vrot.slane %v3604_v24, 1  ;;  %v898_v18 = vsel %vm866_vm1, %v896_v38, %v897_v13  ;;  %v3629_v21 = vmin.f32 %v786_v58, 6.0 }
 0x141   : > { %v1159_v59 = vadd.f32 %v1127_v44, %v1090_v31  ;;  %v1225_v9 = vadd.f32 %v3452_v60, %v1157_v5  ;;  %v759_v0 = vadd.f32 %v2960_v27, %v720_v57  ;;  %v3634_v32 = vmul.f32 %v2970_v34, %v898_v18 }
 0x142   : > { %v1061_v20 = vmul.f32 %v3041_v1, %v898_v18  ;;  %v1128_v29 = vmul.f32 %v2985_v42, %v898_v18  ;;  %v3642_v60 = vsel %vm1380_vm2, %v4672_v48, 0.0  ;;  %v894_v58 = vrot.slane %v3629_v21, 7 }
 0x143   : > { %v1227_v3 = vadd.f32 %v3438_v43, %v1159_v59  ;;  %v1294_v31 = vadd.f32 %v3442_v23, %v1225_v9  ;;  %4761 = vst [vmem:[#allocation61_spill] sm:$0xff] %v3642_v60  ;;  %v3647_v57 = vmul.f32 %v2980_v41, %v3629_v21  ;;  %v3651_v38 = vmul.f32 %v3015_v53, %v3642_v60 }
 0x144   : > { %v1265_v44 = vmul.f32 %v2995_v45, %v3629_v21  ;;  %v1332_v23 = vmul.f32 %v3000_v46, %v3629_v21  ;;  %v895_v52 = vsel %vm866_vm1, %v893_v35, %v894_v58  ;;  %v4673_v47 = vrot.slane %v3629_v21, 1 }
 0x145   : > { %v1296_v43 = vadd.f32 %v1264_v19, %v1227_v3  ;;  %4762 = vst [vmem:[#allocation62_spill] sm:$0xff] %v3651_v38  ;;  %v3657_v15 = vadd.f32 %v1331_v39, %v1294_v31  ;;  %v791_v5 = vmax.f32 %v759_v0, 0.0  ;;  %v992_v19 = vmul.f32 %v2970_v34, %v895_v52  ;;  %v4776_v38 = vld [vmem:[#allocation27_spill] sm:$0xff] }
 0x146   : > { %v1059_v59 = vmul.f32 %v3041_v1, %v895_v52  ;;  %v1126_v9 = vmul.f32 %v2985_v42, %v895_v52  ;;  %v3669_v18 = vsel %vm1380_vm2, %v4673_v47, 0.0  ;;  %v757_v35 = vadd.f32 %v2960_v27, %v3551_v4 }
 0x147   : > { %v3661_v13 = vadd.f32 %v1333_v12, %v1296_v43  ;;  %4764 = vst [vmem:[#allocation64_spill] sm:$0xff] %v3669_v18  ;;  %v3671_v39 = vmin.f32 %v791_v5, 6.0  ;;  %v721_v12 = vmul.f32 %v3292_v61, %v2950_v22  ;;  %v3678_v3 = vadd.f32 %v1061_v20, %v992_v19 }
 0x148   : > { %v1091_v0 = vadd.f32 %v1059_v59, %v3511_v63  ;;  %v1158_v31 = vadd.f32 %v1126_v9, %v3575_v7  ;;  %v3683_v58 = vmul.f32 %v3015_v53, %v3669_v18  ;;  %v789_v5 = vmax.f32 %v757_v35, 0.0 }
 0x149   : > { %4763 = vst [vmem:[#allocation63_spill] sm:$0xff] %v3661_v13  ;;  %4765 = vst [vmem:[#allocation65_spill] sm:$0xff] %v3671_v39  ;;  %v902_v43 = vrot.slane %v3671_v39, 7  ;;  %v3688_v52 = vmul.f32 %v2980_v41, %v3671_v39  ;;  %v3692_v4 = vmul.f32 %v2995_v45, %v3671_v39  ;;  %v3696_v61 = vmul.f32 %v3000_v46, %v3671_v39 }
 0x14a   : > { %4766 = vst [vmem:[#allocation66_spill] sm:$0xff] %v3683_v58  ;;  %v1160_v63 = vadd.f32 %v1128_v29, %v1091_v0  ;;  %v1226_v7 = vadd.f32 %v3534_v55, %v1158_v31  ;;  %v760_v59 = vadd.f32 %v2960_v27, %v721_v12  ;;  %v719_v9 = vmul.f32 %v2950_v22, %v3302_v28 }
 0x14b   : > { %v963_v19 = vsel %vm866_vm1, 0.0, %v902_v43  ;;  %v4767_v48 = vrot.slane %v3049_v10, 1  ;;  %v4768_v33 = vrot.slane %v3007_v51, 1  ;;  %v3718_v31 = vmin.f32 %v789_v5, 6.0 }
 0x14c   : > { %v1228_v29 = vadd.f32 %v3494_v17, %v1160_v63  ;;  %v1295_v55 = vadd.f32 %v3498_v30, %v1226_v7  ;;  %v3714_v35 = vmul.f32 %v2970_v34, %v963_v19  ;;  %v1064_v0 = vmul.f32 %v3041_v1, %v963_v19  ;;  %v4770_v30 = vld [vmem:[#allocation10_spill] sm:$0xff] }
 0x14d   : > { %v3709_v47 = vsel %vm1380_vm2, %v4768_v33, %v4767_v48  ;;  %v1131_v12 = vmul.f32 %v2985_v42, %v963_v19  ;;  %4769 = vst [vmem:[#allocation67_spill] sm:$0xff] %v3718_v31  ;;  %v792_v28 = vmax.f32 %v760_v59, 0.0  ;;  %v758_v10 = vadd.f32 %v2960_v27, %v719_v9  ;;  %v4773_v59 = vld [vmem:[#allocation15_spill] sm:$0xff] }
 0x14e   : > { %v1297_v51 = vadd.f32 %v1265_v44, %v1228_v29  ;;  %v3721_v20 = vadd.f32 %v1332_v23, %v1295_v55  ;;  %v1558_v17 = vmul.f32 %v3074_v26, %v3709_v47  ;;  %v1588_v33 = vadd.f32 %v4770_v30, %v3136_v14  ;;  %v4774_v9 = vld [vmem:[#allocation11_spill] sm:$0xff]  ;;  %v4775_v55 = vld [vmem:[#allocation30_spill] sm:$0xff] }
 0x14f   : > { %v899_v48 = vrot.slane %v3718_v31, 7  ;;  %v3730_v63 = vmul.f32 %v2980_v41, %v3718_v31  ;;  %v1268_v7 = vmul.f32 %v2995_v45, %v3718_v31  ;;  %v1335_v44 = vmul.f32 %v3000_v46, %v3718_v31 }
 0x150   : > { %v3736_v23 = vadd.f32 %v1334_v36, %v1297_v51  ;;  %v3739_v26 = vmin.f32 %v792_v28, 6.0  ;;  %v790_v19 = vmax.f32 %v758_v10, 0.0  ;;  %v1589_v29 = vadd.f32 %v4774_v9, %v4773_v59 }
 0x151   : > { %v962_v14 = vsel %vm866_vm1, 0.0, %v899_v48  ;;  %v1590_v30 = vadd.f32 %v1558_v17, %v4775_v55  ;;  %v1625_v39 = vmul.f32 %v4776_v38, %v3709_v47 }
 0x152   : > { %4771 = vst [vmem:[#allocation10_spill] sm:$0xff] %v3736_v23  ;;  %4772 = vst [vmem:[#allocation68_spill] sm:$0xff] %v3739_v26  ;;  %v995_v58 = vmul.f32 %v2970_v34, %v962_v14  ;;  %v1062_v36 = vmul.f32 %v3041_v1, %v962_v14  ;;  %v1129_v51 = vmul.f32 %v2985_v42, %v962_v14  ;;  %v903_v28 = vrot.slane %v3739_v26, 7 }
 0x153   : > { %v3753_v10 = vmul.f32 %v2980_v41, %v3739_v26  ;;  %v3757_v59 = vmul.f32 %v2995_v45, %v3739_v26  ;;  %v3761_v17 = vmul.f32 %v3000_v46, %v3739_v26  ;;  %v4681_v9 = vrot.slane %v3739_v26, 1 }
 0x154   : > { %v1094_v55 = vadd.f32 %v1062_v36, %v3589_v62  ;;  %v3765_v5 = vadd.f32 %v1064_v0, %v995_v58  ;;  %v1161_v14 = vadd.f32 %v1129_v51, %v3609_v2  ;;  %v904_v31 = vsel %vm866_vm1, %v902_v43, %v903_v28  ;;  %v4779_v43 = vld [vmem:[#allocation9_spill] sm:$0xff]  ;;  %v4780_v51 = vld [vmem:[#allocation32_spill] sm:$0xff] }
 0x155   : > { %v3770_v60 = vmul.f32 %v2970_v34, %v904_v31  ;;  %v1065_v13 = vmul.f32 %v3041_v1, %v904_v31  ;;  %v1132_v23 = vmul.f32 %v2985_v42, %v904_v31  ;;  %v3777_v24 = vsel %vm1380_vm2, %v4681_v9, 0.0  ;;  %v3791_v31 = vld [vmem:[%s4630_s5] ss:$0 sm:$0xff] }
 0x156   : > { %4777 = vst [vmem:[#allocation15_spill] sm:$0xff] %v3777_v24  ;;  %v1163_v18 = vadd.f32 %v1131_v12, %v1094_v55  ;;  %v1229_v62 = vadd.f32 %v3585_v37, %v1161_v14  ;;  %v3782_v2 = vmul.f32 %v3015_v53, %v3777_v24  ;;  %v3784_v58 = vmin.f32 %v790_v19, 6.0 }
 0x157   : > { %v1626_v0 = vmul.f32 %v4776_v38, %v4779_v43  ;;  %v1657_v36 = vadd.f32 %v1625_v39, %v1588_v33  ;;  %v724_v12 = vmul.f32 %v4780_v51, %v2950_v22  ;;  %v722_v37 = vmul.f32 %v2950_v22, %v3341_v40  ;;  %v3812_v22 = vld [vmem:[%s4631_s6] ss:$0 sm:$0xff] }
 0x158   : > { %4778 = vst [vmem:[#allocation11_spill] sm:$0xff] %v3782_v2  ;;  %v1231_v28 = vadd.f32 %v3568_v54, %v1163_v18  ;;  %v1298_v19 = vadd.f32 %v3572_v49, %v1229_v62  ;;  %v900_v55 = vrot.slane %v3784_v58, 7  ;;  %v3802_v39 = vmul.f32 %v2980_v41, %v3784_v58 }
 0x159   : > { %v1269_v33 = vmul.f32 %v2995_v45, %v3784_v58  ;;  %v1336_v14 = vmul.f32 %v3000_v46, %v3784_v58  ;;  %v4682_v51 = vrot.slane %v3784_v58, 1  ;;  %v1658_v9 = vadd.f32 %v1626_v0, %v1589_v29 }
 0x15a   : > { %v1300_v40 = vadd.f32 %v1268_v7, %v1231_v28  ;;  %v3814_v54 = vadd.f32 %v1335_v44, %v1298_v19  ;;  %v901_v41 = vsel %vm866_vm1, %v899_v48, %v900_v55  ;;  %v1696_v49 = vmul.f32 %v3791_v31, %v1657_v36 }
 0x15b   : > { %v996_v18 = vmul.f32 %v2970_v34, %v901_v41  ;;  %v1063_v62 = vmul.f32 %v3041_v1, %v901_v41  ;;  %v1130_v2 = vmul.f32 %v2985_v42, %v901_v41  ;;  %v3824_v29 = vsel %vm1380_vm2, %v4682_v51, 0.0 }
 0x15c   : > { %4781 = vst [vmem:[#allocation30_spill] sm:$0xff] %v3814_v54  ;;  %4782 = vst [vmem:[#allocation27_spill] sm:$0xff] %v3824_v29  ;;  %v3827_v7 = vadd.f32 %v3696_v61, %v1300_v40  ;;  %v3831_v48 = vmul.f32 %v3015_v53, %v3824_v29  ;;  %v1697_v44 = vmul.f32 %v3791_v31, %v1658_v9  ;;  %v4785_v40 = vld [vmem:[#allocation28_spill] sm:$0xff] }
 0x15d   : > { %v1735_v34 = vadd.f32 %v3812_v22, %v1696_v49  ;;  %v1095_v0 = vadd.f32 %v1063_v62, %v3634_v32  ;;  %v3836_v42 = vadd.f32 %v1065_v13, %v996_v18  ;;  %v1162_v36 = vadd.f32 %v1130_v2, %v3678_v3  ;;  %v4796_v29 = vld [vmem:[#allocation16_spill] sm:$0xff] }
 0x15e   : > { %4783 = vst [vmem:[#allocation9_spill] sm:$0xff] %v3827_v7  ;;  %4784 = vst [vmem:[#allocation32_spill] sm:$0xff] %v3831_v48  ;;  %v763_v28 = vadd.f32 %v2960_v27, %v724_v12  ;;  %v1736_v19 = vadd.f32 %v3812_v22, %v1697_v44  ;;  %v761_v55 = vadd.f32 %v2960_v27, %v722_v37  ;;  %v4788_v37 = vld [vmem:[#allocation35_spill] sm:$0xff] }
 0x15f   : > { %v1767_v61 = vmax.f32 %v1735_v34, 0.0  ;;  %v1659_v53 = vadd.f32 %v4785_v40, %v1590_v30  ;;  %v1164_v41 = vadd.f32 %v1132_v23, %v1095_v0  ;;  %v1230_v9 = vadd.f32 %v3647_v57, %v1162_v36 }
 0x160   : > { %v795_v51 = vmax.f32 %v763_v28, 0.0  ;;  %v1699_v32 = vmul.f32 %v3791_v31, %v3349_v16  ;;  %v1768_v13 = vmax.f32 %v1736_v19, 0.0  ;;  %v793_v18 = vmax.f32 %v761_v55, 0.0  ;;  %v3858_v16 = vld [vmem:[%s4627_s2] ss:$0 sm:$0xff] }
 0x161   : > { %v1799_v49 = vmin.f32 %v1767_v61, 6.0  ;;  %v1698_v3 = vmul.f32 %v3791_v31, %v1659_v53  ;;  %v1232_v2 = vadd.f32 %v3615_v56, %v1164_v41  ;;  %v1299_v12 = vadd.f32 %v3619_v8, %v1230_v9  ;;  %v3905_v53 = vld [vmem:[%s4629_s4 + $0x6] ss:$0 sm:$0xff]  ;;  %v3911_v9 = vld [vmem:[%s4629_s4 + $0x4] ss:$0 sm:$0xff] }
 0x162   : > { %v3849_v62 = vmin.f32 %v795_v51, 6.0  ;;  %v1738_v27 = vadd.f32 %v3812_v22, %v1699_v32  ;;  %v1800_v23 = vmin.f32 %v1768_v13, 6.0  ;;  %v3852_v30 = vmin.f32 %v793_v18, 6.0  ;;  %v3868_v51 = vld [vmem:[%s4629_s4 + $0x1] ss:$0 sm:$0xff] }
 0x163   : > { %v1737_v57 = vadd.f32 %v3812_v22, %v1698_v3  ;;  %v725_v44 = vmul.f32 %v3858_v16, %v4788_v37  ;;  %v1301_v56 = vadd.f32 %v1269_v33, %v1232_v2  ;;  %v3862_v34 = vadd.f32 %v1336_v14, %v1299_v12  ;;  %v4792_v3 = vld [vmem:[#allocation8_spill] sm:$0xff] }
 0x164   : > { %4786 = vst [vmem:[#allocation28_spill] sm:$0xff] %v3849_v62  ;;  %4787 = vst [vmem:[#allocation69_spill] sm:$0xff] %v3852_v30  ;;  %v4684_v8 = vrot.slane %v3849_v62, 7  ;;  %v3872_v0 = vmul.f32 %v3868_v51, %v3849_v62  ;;  %v1831_v36 = vpack.c.bf16 %v1800_v23, %v1799_v49  ;;  %v3876_v28 = vmul.f32 %v2995_v45, %v3849_v62  ;;  %v3896_v45 = vld [vmem:[%s4629_s4] ss:$0 sm:$0xff] }
 0x165   : > { %4789 = vst [vmem:[#allocation35_spill] sm:$0xff] %v3862_v34  ;;  %v1341_v33 = vmul.f32 %v3000_v46, %v3849_v62  ;;  %v3882_v19 = vadd.f32 %v3761_v17, %v1301_v56  ;;  %v4683_v55 = vrot.slane %v3852_v30, 7  ;;  %v3890_v40 = vmul.f32 %v3868_v51, %v3852_v30  ;;  %v3921_v49 = vld [vmem:[%s4629_s4 + $0x7] ss:$0 sm:$0xff] }
 0x166   : > { %v965_v61 = vsel %vm866_vm1, 0.0, %v4684_v8  ;;  %2695 = vmatprep.mubr.msk.bf16.mxu0 %vm1895_vm3, %v1831_v36  ;;  %v1272_v32 = vmul.f32 %v3911_v9, %v3852_v30  ;;  %v1339_v18 = vmul.f32 %v3921_v49, %v3852_v30  ;;  %v1769_v2 = vmax.f32 %v1737_v57, 0.0  ;;  %v4793_v57 = vld [vmem:[#allocation23_spill] sm:$0xff] }
 0x167   : > { %4790 = vst [vmem:[#allocation70_spill] sm:$0xff] %v3882_v19  ;;  %v3899_v46 = vmul.f32 %v3896_v45, %v965_v61  ;;  %v1068_v17 = vmul.f32 %v3041_v1, %v965_v61  ;;  %v1135_v41 = vmul.f32 %v3905_v53, %v965_v61  ;;  %v964_v13 = vsel %vm866_vm1, 0.0, %v4683_v55  ;;  %v3932_v61 = vld [vmem:[%s4628_s3] ss:$0 sm:$0xff]  ;;  %v4791_v55 = vld [vmem:[#allocation36_spill] sm:$0xff]  ;;  %v4794_v19 = vld [vmem:[#allocation19_spill] sm:$0xff] }
 0x168   : > { %v999_v12 = vmul.f32 %v3896_v45, %v964_v13  ;;  %v1066_v23 = vmul.f32 %v3041_v1, %v964_v13  ;;  %v1133_v37 = vmul.f32 %v3905_v53, %v964_v13  ;;  %v1770_v56 = vmax.f32 %v1738_v27, 0.0 }
 0x169   : > { %v1801_v36 = vmin.f32 %v1769_v2, 6.0  ;;  %v764_v14 = vadd.f32 %v3932_v61, %v725_v44  ;;  %v723_v8 = vmul.f32 %v3858_v16, %v4791_v55  ;;  %v1079_v48 = vadd.f32 %v4793_v57, %v4792_v3  ;;  %v4795_v44 = vld [vmem:[#allocation20_spill] sm:$0xff] }
 0x16a   : > { %v1098_v24 = vadd.f32 %v1066_v23, %v3714_v35  ;;  %v3940_v1 = vadd.f32 %v1068_v17, %v999_v12  ;;  %v1165_v27 = vadd.f32 %v1133_v37, %v3765_v5  ;;  %v1802_v13 = vmin.f32 %v1770_v56, 6.0  ;;  %v4797_v57 = vld [vmem:[#allocation40_spill] sm:$0xff]  ;;  %v4798_v35 = vld [vmem:[#allocation29_spill] sm:$0xff] }
 0x16b   : > { %v796_v2 = vmax.f32 %v764_v14, 0.0  ;;  %v762_v7 = vadd.f32 %v3932_v61, %v723_v8  ;;  %v1116_v26 = vmul.f32 %v3905_v53, %v4794_v19  ;;  %v1147_v34 = vadd.f32 %v4796_v29, %v4795_v44  ;;  %v4800_v14 = vld [vmem:[#allocation6_spill] sm:$0xff] }
 0x16c   : > { %v1167_v55 = vadd.f32 %v1135_v41, %v1098_v24  ;;  %v1233_v54 = vadd.f32 %v3730_v63, %v1165_v27  ;;  %v1832_v3 = vpack.c.bf16 %v1802_v13, %v1801_v36  ;;  %v1356_v17 = vadd.f32 %v4798_v35, %v4797_v57  ;;  %v4801_v24 = vld [vmem:[#allocation37_spill] sm:$0xff]  ;;  %v4802_v63 = vld [vmem:[#allocation14_spill] sm:$0xff]  ;;  %v4806_v27 = vld [vmem:[#allocation7_spill] sm:$0xff] }
 0x16d   : > { %v3951_v12 = vmin.f32 %v796_v2, 6.0  ;;  %v794_v5 = vmax.f32 %v762_v7, 0.0  ;;  %v1148_v23 = vadd.f32 %v1116_v26, %v1079_v48  ;;  %v1215_v37 = vadd.f32 %v4800_v14, %v1147_v34  ;;  %v4807_v2 = vld [vmem:[#allocation17_spill] sm:$0xff] }
 0x16e   : > { %v1235_v8 = vadd.f32 %v3688_v52, %v1167_v55  ;;  %v1302_v19 = vadd.f32 %v3692_v4, %v1233_v54  ;;  %2696 = vmatmul.mubr.msk.bf16.vlgmr.msra.gmra.mrb[32].mxu0 %vm1895_vm3, %v1832_v3  ;;  %v1357_v29 = vadd.f32 %v4801_v24, %v3470_v11  ;;  %v1393_v41 = vrot.slane %v4802_v63, 1  ;;  %v4808_v55 = vld [vmem:[#allocation12_spill] sm:$0xff] }
 0x16f   : > { %4799 = vst [vmem:[#allocation36_spill] sm:$0xff] %v3951_v12  ;;  %v909_v56 = vrot.slane %v3951_v12, 7  ;;  %v3963_v36 = vmul.f32 %v3868_v51, %v3951_v12  ;;  %v3967_v26 = vmul.f32 %v3911_v9, %v3951_v12  ;;  %v3971_v52 = vmul.f32 %v3921_v49, %v3951_v12 }
 0x170   : > { %v1304_v4 = vadd.f32 %v1272_v32, %v1235_v8  ;;  %v3973_v54 = vadd.f32 %v1339_v18, %v1302_v19  ;;  %v4690_v11 = vrot.slane %v3951_v12, 1  ;;  %v3976_v7 = vmin.f32 %v794_v5, 6.0  ;;  %v3994_v18 = vld [vmem:[%s4629_s4 + $0x3] ss:$0 sm:$0xff]  ;;  %v4013_v19 = vld [vmem:[%s4629_s4 + $0x2] ss:$0 sm:$0xff] }
 0x171   : > { %v4805_v48 = vrot.slane %v3849_v62, 7  ;;  %v1216_v13 = vadd.f32 %v4806_v27, %v1148_v23  ;;  %v1284_v44 = vadd.f32 %v4807_v2, %v1215_v37  ;;  %v4809_v3 = vrot.slane %v4808_v55, 1  ;;  %v4815_v2 = vld [vmem:[#allocation13_spill] sm:$0xff] }
 0x172   : > { %4803 = vst [vmem:[#allocation8_spill] sm:$0xff] %v3973_v54  ;;  %4804 = vst [vmem:[#allocation23_spill] sm:$0xff] %v3976_v7  ;;  %v3986_v35 = vadd.f32 %v1341_v33, %v1304_v4  ;;  %v4001_v14 = vsel %vm1380_vm2, %v4690_v11, 0.0  ;;  %v906_v33 = vrot.slane %v3976_v7, 7  ;;  %v4006_v37 = vmul.f32 %v3868_v51, %v3976_v7  ;;  %v4813_v4 = vld [vmem:[#allocation21_spill] sm:$0xff] }
 0x173   : > { %v910_v34 = vsel %vm866_vm1, %v4805_v48, %v909_v56  ;;  %v1394_v57 = vsel %vm1380_vm2, %v4809_v3, %v1393_v41  ;;  %4811 = vst [vmem:[#allocation20_spill] sm:$0xff] %v4001_v14  ;;  %v1273_v8 = vmul.f32 %v3911_v9, %v3976_v7  ;;  %v4017_v24 = vmul.f32 %v4013_v19, %v4001_v14 }
 0x174   : > { %4810 = vst [vmem:[#allocation19_spill] sm:$0xff] %v3986_v35  ;;  %v3989_v32 = vmul.f32 %v3896_v45, %v910_v34  ;;  %v1069_v5 = vmul.f32 %v3994_v18, %v910_v34  ;;  %v1136_v23 = vmul.f32 %v3905_v53, %v910_v34  ;;  %v1340_v63 = vmul.f32 %v3921_v49, %v3976_v7 }
 0x175   : > { %4812 = vst [vmem:[#allocation16_spill] sm:$0xff] %v4017_v24  ;;  %v4693_v56 = vrot.slane %v3976_v7, 1  ;;  %v1285_v48 = vadd.f32 %v4813_v4, %v1216_v13  ;;  %v4814_v34 = vrot.slane %v3852_v30, 7  ;;  %v1352_v55 = vadd.f32 %v4815_v2, %v1284_v44  ;;  %v4818_v44 = vld [vmem:[#allocation18_spill] sm:$0xff] }
 0x176   : > { %v1469_v3 = vsel %vm1380_vm2, %v1393_v41, 0.0  ;;  %v1491_v11 = vmul.f32 %v4013_v19, %v3709_v47  ;;  %v1492_v47 = vmul.f32 %v4013_v19, %v4779_v43  ;;  %v1495_v4 = vmul.f32 %v4013_v19, %v1394_v57  ;;  %v4819_v43 = vld [vmem:[#allocation24_spill] sm:$0xff] }
 0x177   : > { %v907_v27 = vsel %vm866_vm1, %v4814_v34, %v906_v33  ;;  %v4036_v13 = vsel %vm1380_vm2, %v4693_v56, 0.0  ;;  %v1353_v41 = vadd.f32 %v4818_v44, %v1285_v48  ;;  %v1496_v56 = vmul.f32 %v4013_v19, %v1469_v3  ;;  %v4056_v48 = vld [vmem:[%s4629_s4 + $0x5] ss:$0 sm:$0xff] }
 0x178   : > { %v1000_v24 = vmul.f32 %v3896_v45, %v907_v27  ;;  %v1067_v14 = vmul.f32 %v3994_v18, %v907_v27  ;;  %v1134_v35 = vmul.f32 %v3905_v53, %v907_v27  ;;  %4816 = vst [vmem:[#allocation40_spill] sm:$0xff] %v4036_v13  ;;  %v4040_v33 = vmul.f32 %v4013_v19, %v4036_v13  ;;  %v4825_v13 = vld [vmem:[#allocation31_spill] sm:$0xff] }
 0x179   : > { %v1523_v62 = vadd.f32 %v1491_v11, %v1352_v55  ;;  %v1524_v12 = vadd.f32 %v1492_v47, %v1353_v41  ;;  %v4051_v54 = vadd.f32 %v1495_v4, %v1356_v17  ;;  %v1560_v44 = vmul.f32 %v4056_v48, %v4819_v43  ;;  %v4822_v4 = vld [vmem:[#allocation43_spill] sm:$0xff] }
 0x17a   : > { %4817 = vst [vmem:[#allocation29_spill] sm:$0xff] %v4040_v33  ;;  %v1099_v34 = vadd.f32 %v1067_v14, %v3770_v60  ;;  %v4047_v2 = vadd.f32 %v1069_v5, %v1000_v24  ;;  %v1166_v27 = vadd.f32 %v1134_v35, %v3836_v42  ;;  %v4061_v5 = vadd.f32 %v1496_v56, %v1357_v29  ;;  %v4820_v42 = vld [vmem:[#allocation25_spill] sm:$0xff]  ;;  %v4821_v29 = vld [vmem:[#allocation39_spill] sm:$0xff] }
 0x17b   : > { %v1561_v35 = vmul.f32 %v4056_v48, %v4820_v42  ;;  %v1562_v11 = vmul.f32 %v4056_v48, %v1394_v57  ;;  %v1563_v17 = vmul.f32 %v4056_v48, %v1469_v3  ;;  %v1592_v14 = vadd.f32 %v1560_v44, %v1523_v62 }
 0x17c   : > { %v1168_v33 = vadd.f32 %v1136_v23, %v1099_v34  ;;  %v1234_v60 = vadd.f32 %v3802_v39, %v1166_v27  ;;  %v1629_v24 = vmul.f32 %v4776_v38, %v1394_v57  ;;  %v1630_v23 = vmul.f32 %v4776_v38, %v1469_v3  ;;  %v4823_v27 = vld [vmem:[#allocation34_spill] sm:$0xff] }
 0x17d   : > { %v1593_v47 = vadd.f32 %v1561_v35, %v1524_v12  ;;  %v728_v56 = vmul.f32 %v3858_v16, %v4821_v29  ;;  %v726_v34 = vmul.f32 %v3858_v16, %v4822_v4  ;;  %v4824_v42 = vrot.slane %v4823_v27, 1  ;;  %v4828_v35 = vld [vmem:[#allocation50_spill] sm:$0xff]  ;;  %v4832_v4 = vld [vmem:[#allocation44_spill] sm:$0xff] }
 0x17e   : > { %v1236_v55 = vadd.f32 %v3753_v10, %v1168_v33  ;;  %v1303_v41 = vadd.f32 %v3757_v59, %v1234_v60  ;;  %v1661_v39 = vadd.f32 %v1629_v24, %v1592_v14  ;;  %v4826_v62 = vrot.slane %v4825_v13, 1  ;;  %v4829_v14 = vld [vmem:[#allocation26_spill] sm:$0xff] }
 0x17f   : > { %v1662_v59 = vadd.f32 %v1630_v23, %v1593_v47  ;;  %v1493_v12 = vmul.f32 %v4013_v19, %v4819_v43  ;;  %v767_v44 = vadd.f32 %v3932_v61, %v728_v56  ;;  %v765_v60 = vadd.f32 %v3932_v61, %v726_v34 }
 0x180   : > { %v4080_v57 = vsel %vm1380_vm2, %v4826_v62, %v4824_v42  ;;  %v1305_v10 = vadd.f32 %v1273_v8, %v1236_v55  ;;  %v4082_v33 = vadd.f32 %v1340_v63, %v1303_v41  ;;  %v1700_v3 = vmul.f32 %v3791_v31, %v1661_v39  ;;  %v4831_v63 = vld [vmem:[#allocation41_spill] sm:$0xff] }
 0x181   : > { %v1526_v24 = vadd.f32 %v4829_v14, %v4828_v35  ;;  %v1701_v8 = vmul.f32 %v3791_v31, %v1662_v59  ;;  %v1525_v55 = vadd.f32 %v1493_v12, %v4831_v63  ;;  %v1631_v41 = vmul.f32 %v4776_v38, %v4080_v57  ;;  %v4834_v59 = vld [vmem:[#allocation49_spill] sm:$0xff] }
 0x182   : > { %4827 = vst [vmem:[#allocation6_spill] sm:$0xff] %v4082_v33  ;;  %v4092_v13 = vadd.f32 %v3971_v52, %v1305_v10  ;;  %v1739_v43 = vadd.f32 %v3812_v22, %v1700_v3  ;;  %v799_v47 = vmax.f32 %v767_v44, 0.0  ;;  %v797_v23 = vmax.f32 %v765_v60, 0.0  ;;  %v4833_v52 = vld [vmem:[#allocation46_spill] sm:$0xff]  ;;  %v4836_v33 = vld [vmem:[#allocation33_spill] sm:$0xff] }
 0x183   : > { %v1595_v39 = vadd.f32 %v1563_v17, %v1526_v24  ;;  %v1740_v29 = vadd.f32 %v3812_v22, %v1701_v8  ;;  %v1594_v56 = vadd.f32 %v1562_v11, %v1525_v55  ;;  %v1632_v34 = vmul.f32 %v4776_v38, %v4832_v4 }
 0x184   : > { %4830 = vst [vmem:[#allocation37_spill] sm:$0xff] %v4092_v13  ;;  %v729_v27 = vmul.f32 %v3858_v16, %v4833_v52  ;;  %v1771_v42 = vmax.f32 %v1739_v43, 0.0  ;;  %v4104_v62 = vmin.f32 %v799_v47, 6.0  ;;  %v4106_v10 = vmin.f32 %v797_v23, 6.0 }
 0x185   : > { %v727_v12 = vmul.f32 %v3858_v16, %v4834_v59  ;;  %v1772_v3 = vmax.f32 %v1740_v29, 0.0  ;;  %v1663_v44 = vadd.f32 %v1631_v41, %v1594_v56  ;;  %v1664_v17 = vadd.f32 %v1632_v34, %v1595_v39 }
 0x186   : > { %v768_v60 = vadd.f32 %v3932_v61, %v729_v27  ;;  %v1803_v11 = vmin.f32 %v1771_v42, 6.0  ;;  %v914_v35 = vrot.slane %v4104_v62, 7  ;;  %v1278_v38 = vmul.f32 %v3911_v9, %v4104_v62 }
 0x187   : > { %v1345_v14 = vmul.f32 %v3921_v49, %v4104_v62  ;;  %v1804_v24 = vmin.f32 %v1772_v3, 6.0  ;;  %v1428_v8 = vrot.slane %v4104_v62, 1  ;;  %v4698_v63 = vrot.slane %v4106_v10, 7 }
 0x188   : > { %v1209_v16 = vmul.f32 %v3868_v51, %v4106_v10  ;;  %v967_v55 = vsel %vm866_vm1, 0.0, %v914_v35  ;;  %v1276_v41 = vmul.f32 %v3911_v9, %v4106_v10  ;;  %v1343_v43 = vmul.f32 %v3921_v49, %v4106_v10 }
 0x189   : > { %v1833_v23 = vpack.c.bf16 %v1804_v24, %v1803_v11  ;;  %v1072_v39 = vmul.f32 %v3994_v18, %v967_v55  ;;  %v1139_v29 = vmul.f32 %v3905_v53, %v967_v55  ;;  %v966_v56 = vsel %vm866_vm1, 0.0, %v4698_v63  ;;  %v4835_v11 = vld [vmem:[#allocation2_spill] sm:$0xff] }
 0x18a   : > { %v1003_v34 = vmul.f32 %v3896_v45, %v966_v56  ;;  %v1070_v52 = vmul.f32 %v3994_v18, %v966_v56  ;;  %v1137_v27 = vmul.f32 %v3905_v53, %v966_v56  ;;  %v1702_v42 = vmul.f32 %v3791_v31, %v1663_v44 }
 0x18b   : > { %2699 = vmatprep.mubr.msk.bf16.mxu1 %vm1895_vm3, %v1833_v23  ;;  %v1703_v62 = vmul.f32 %v3791_v31, %v1664_v17  ;;  %v800_v59 = vmax.f32 %v768_v60, 0.0  ;;  %v766_v3 = vadd.f32 %v3932_v61, %v727_v12  ;;  %v4140_v24 = vmul.f32 %v3905_v53, %v4835_v11  ;;  %v4838_v60 = vld [vmem:[#allocation22_spill] sm:$0xff]  ;;  %v4840_v11 = vld [vmem:[#allocation5_spill] sm:$0xff] }
 0x18c   : > { %v1102_v55 = vadd.f32 %v1070_v52, %v3899_v46  ;;  %v1104_v47 = vadd.f32 %v1072_v39, %v1003_v34  ;;  %v1169_v63 = vadd.f32 %v1137_v27, %v3940_v1  ;;  %v1741_v56 = vadd.f32 %v3812_v22, %v1702_v42 }
 0x18d   : > { %v1742_v44 = vadd.f32 %v3812_v22, %v1703_v62  ;;  %v832_v13 = vmin.f32 %v800_v59, 6.0  ;;  %v798_v23 = vmax.f32 %v766_v3, 0.0  ;;  %v4837_v17 = vrot.slane %v4836_v33, 1 }
 0x18e   : > { %v4839_v30 = vrot.slane %v4838_v60, 1  ;;  %v1171_v12 = vadd.f32 %v1139_v29, %v1102_v55  ;;  %v1173_v7 = vadd.f32 %v4840_v11, %v1104_v47  ;;  %v1237_v46 = vadd.f32 %v3890_v40, %v1169_v63 }
 0x18f   : > { %v1773_v39 = vmax.f32 %v1741_v56, 0.0  ;;  %v1774_v1 = vmax.f32 %v1742_v44, 0.0  ;;  %v915_v34 = vrot.slane %v832_v13, 7  ;;  %v4156_v52 = vmul.f32 %v3911_v9, %v832_v13 }
 0x190   : > { %v4151_v61 = vsel %vm1380_vm2, %v4839_v30, %v4837_v17  ;;  %v4159_v27 = vmul.f32 %v3921_v49, %v832_v13  ;;  %v1239_v33 = vadd.f32 %v3872_v0, %v1171_v12  ;;  %v1241_v42 = vadd.f32 %v1209_v16, %v1173_v7 }
 0x191   : > { %v1306_v30 = vadd.f32 %v3876_v28, %v1237_v46  ;;  %v1805_v62 = vmin.f32 %v1773_v39, 6.0  ;;  %v1806_v29 = vmin.f32 %v1774_v1, 6.0  ;;  %v916_v47 = vsel %vm866_vm1, %v914_v35, %v915_v34  ;;  %v4842_v39 = vld [vmem:[#allocation38_spill] sm:$0xff] }
 0x192   : > { %v1429_v59 = vrot.slane %v832_v13, 1  ;;  %v4164_v40 = vmin.f32 %v798_v23, 6.0  ;;  %v1308_v63 = vadd.f32 %v1276_v41, %v1239_v33  ;;  %v4166_v3 = vadd.f32 %v1278_v38, %v1241_v42  ;;  %v4188_v38 = vld [vmem:[%s4629_s4 + $0x8] ss:$0 sm:$0xff]  ;;  %v4843_v1 = vld [vmem:[#allocation54_spill] sm:$0xff]  ;;  %v4845_v33 = vld [vmem:[#allocation48_spill] sm:$0xff] }
 0x193   : > { %v4168_v55 = vadd.f32 %v1343_v43, %v1306_v30  ;;  %v1073_v56 = vmul.f32 %v3994_v18, %v916_v47  ;;  %v1834_v44 = vpack.c.bf16 %v1806_v29, %v1805_v62  ;;  %v1140_v0 = vmul.f32 %v3905_v53, %v916_v47 }
 0x194   : > { %v4173_v7 = vsel %vm1380_vm2, %v1428_v8, %v1429_v59  ;;  %v1481_v28 = vsel %vm1380_vm2, %v1429_v59, 0.0  ;;  %v4176_v16 = vadd.f32 %v1345_v14, %v1308_v63  ;;  %v912_v14 = vrot.slane %v4164_v40, 7 }
 0x195   : > { %v4180_v13 = vmul.f32 %v4056_v48, %v4173_v7  ;;  %v4183_v35 = vmul.f32 %v4056_v48, %v1481_v28  ;;  %v4191_v41 = vmul.f32 %v4188_v38, %v1481_v28  ;;  %2700 = vmatmul.mubr.msk.bf16.vlgmr.msra.gmra.mrb[0].mxu1 %vm1895_vm3, %v1834_v44  ;;  %v1210_v8 = vmul.f32 %v3868_v51, %v4164_v40 }
 0x196   : > { %v1277_v43 = vmul.f32 %v3911_v9, %v4164_v40  ;;  %v1344_v23 = vmul.f32 %v3921_v49, %v4164_v40  ;;  %v1426_v17 = vrot.slane %v4164_v40, 1  ;;  %v1564_v60 = vmul.f32 %v4056_v48, %v4080_v57 }
 0x197   : > { %v1565_v12 = vmul.f32 %v4056_v48, %v4832_v4  ;;  %v1633_v11 = vmul.f32 %v4188_v38, %v4151_v61  ;;  %v4841_v46 = vrot.slane %v4106_v10, 7  ;;  %v1634_v9 = vmul.f32 %v4188_v38, %v4842_v39 }
 0x198   : > { %v4844_v34 = vrot.slane %v4843_v1, 1  ;;  %v4846_v42 = vrot.slane %v4845_v33, 1  ;;  %v1497_v62 = vmul.f32 %v4013_v19, %v4080_v57  ;;  %v4226_v59 = vsel %vm1380_vm2, %v1426_v17, 0.0  ;;  %v4847_v57 = vld [vmem:[#allocation52_spill] sm:$0xff] }
 0x199   : > { %v913_v51 = vsel %vm866_vm1, %v4841_v46, %v912_v14  ;;  %v4230_v63 = vmul.f32 %v4013_v19, %v4226_v59  ;;  %v1596_v44 = vadd.f32 %v1564_v60, %v4051_v54  ;;  %v1597_v28 = vadd.f32 %v1565_v12, %v4061_v5  ;;  %v4848_v46 = vld [vmem:[#allocation47_spill] sm:$0xff] }
 0x19a   : > { %v1403_v30 = vsel %vm1380_vm2, %v4846_v42, %v4844_v34  ;;  %v1004_v4 = vmul.f32 %v3896_v45, %v913_v51  ;;  %v1071_v29 = vmul.f32 %v3994_v18, %v913_v51  ;;  %v1138_v47 = vmul.f32 %v3905_v53, %v913_v51 }
 0x19b   : > { %v1529_v14 = vadd.f32 %v1497_v62, %v4847_v57  ;;  %v1530_v51 = vadd.f32 %v4848_v46, %v3606_v6  ;;  %v1665_v1 = vadd.f32 %v1633_v11, %v1596_v44  ;;  %v1666_v34 = vadd.f32 %v1634_v9, %v1597_v28  ;;  %v4852_v44 = vld [vmem:[#allocation45_spill] sm:$0xff] }
 0x19c   : > { %v1103_v45 = vadd.f32 %v1071_v29, %v3989_v32  ;;  %v1105_v18 = vadd.f32 %v1073_v56, %v1004_v4  ;;  %v1170_v53 = vadd.f32 %v1138_v47, %v4047_v2  ;;  %v1566_v33 = vmul.f32 %v4056_v48, %v4151_v61  ;;  %v4849_v4 = vld [vmem:[#allocation58_spill] sm:$0xff]  ;;  %v4850_v29 = vld [vmem:[#allocation51_spill] sm:$0xff] }
 0x19d   : > { %v1567_v54 = vmul.f32 %v4056_v48, %v4842_v39  ;;  %v1635_v32 = vmul.f32 %v4188_v38, %v1403_v30  ;;  %v1704_v2 = vmul.f32 %v3791_v31, %v1665_v1  ;;  %v1705_v56 = vmul.f32 %v3791_v31, %v1666_v34 }
 0x19e   : > { %v1172_v60 = vadd.f32 %v1140_v0, %v1103_v45  ;;  %v1174_v5 = vadd.f32 %v4140_v24, %v1105_v18  ;;  %v1238_v12 = vadd.f32 %v4006_v37, %v1170_v53  ;;  %v1598_v6 = vadd.f32 %v1566_v33, %v1529_v14 }
 0x19f   : > { %v1599_v11 = vadd.f32 %v1567_v54, %v1530_v51  ;;  %v1636_v0 = vmul.f32 %v4188_v38, %v4849_v4  ;;  %v1743_v24 = vadd.f32 %v3812_v22, %v1704_v2  ;;  %v1744_v37 = vadd.f32 %v3812_v22, %v1705_v56 }
 0x1a0   : > { %v1240_v9 = vadd.f32 %v3963_v36, %v1172_v60  ;;  %v1242_v42 = vadd.f32 %v1210_v8, %v1174_v5  ;;  %v1307_v62 = vadd.f32 %v3967_v26, %v1238_v12  ;;  %v1667_v39 = vadd.f32 %v1635_v32, %v1598_v6  ;;  %v4855_v60 = vld [vmem:[#allocation55_spill] sm:$0xff]  ;;  %v4856_v32 = vld [vmem:[#allocation53_spill] sm:$0xff] }
 0x1a1   : > { %v4851_v47 = vrot.slane %v4850_v29, 1  ;;  %v4853_v28 = vrot.slane %v4852_v44, 1  ;;  %v1668_v26 = vadd.f32 %v1636_v0, %v1599_v11  ;;  %v1775_v45 = vmax.f32 %v1743_v24, 0.0 }
 0x1a2   : > { %v1309_v14 = vadd.f32 %v1277_v43, %v1240_v9  ;;  %v4260_v36 = vadd.f32 %v4156_v52, %v1242_v42  ;;  %v4262_v8 = vadd.f32 %v1344_v23, %v1307_v62  ;;  %v1776_v18 = vmax.f32 %v1744_v37, 0.0  ;;  %v4854_v43 = vld [vmem:[#allocation42_spill] sm:$0xff] }
 0x1a3   : > { %v1406_v57 = vsel %vm1380_vm2, %v4853_v28, %v4851_v47  ;;  %v1706_v53 = vmul.f32 %v3791_v31, %v1667_v39  ;;  %v1499_v46 = vmul.f32 %v4013_v19, %v4151_v61  ;;  %v1707_v1 = vmul.f32 %v3791_v31, %v1668_v26 }
 0x1a4   : > { %v4268_v51 = vadd.f32 %v4159_v27, %v1309_v14  ;;  %v1532_v34 = vadd.f32 %v4854_v43, %v3622_v50  ;;  %v1568_v52 = vmul.f32 %v4056_v48, %v1403_v30  ;;  %v1807_v23 = vmin.f32 %v1775_v45, 6.0  ;;  %v4860_v45 = vld [vmem:[#allocation64_spill] sm:$0xff] }
 0x1a5   : > { %v1808_v33 = vmin.f32 %v1776_v18, 6.0  ;;  %v1745_v54 = vadd.f32 %v3812_v22, %v1706_v53  ;;  %v1531_v5 = vadd.f32 %v1499_v46, %v4855_v60  ;;  %v1746_v12 = vadd.f32 %v3812_v22, %v1707_v1  ;;  %v4861_v18 = vld [vmem:[#allocation60_spill] sm:$0xff]  ;;  %v4863_v46 = vld [vmem:[#allocation57_spill] sm:$0xff]  ;;  %v4865_v60 = vld [vmem:[#allocation10_spill] sm:$0xff] }
 0x1a6   : > { %v1569_v61 = vmul.f32 %v4056_v48, %v4849_v4  ;;  %v1637_v27 = vmul.f32 %v4188_v38, %v1406_v57  ;;  %v1638_v2 = vmul.f32 %v4188_v38, %v4856_v32  ;;  %v4857_v11 = vrot.slane %v3629_v21, 1  ;;  %v4859_v4 = vld [vmem:[#allocation59_spill] sm:$0xff] }
 0x1a7   : > { %v1835_v56 = vpack.c.bf16 %v1808_v33, %v1807_v23  ;;  %v1777_v50 = vmax.f32 %v1745_v54, 0.0  ;;  %v1600_v6 = vadd.f32 %v1568_v52, %v1531_v5  ;;  %v4858_v9 = vrot.slane %v3543_v25, 1  ;;  %v4866_v5 = vld [vmem:[#allocation56_spill] sm:$0xff] }
 0x1a8   : > { %v1778_v62 = vmax.f32 %v1746_v12, 0.0  ;;  %v1601_v0 = vadd.f32 %v1569_v61, %v1532_v34  ;;  %v1501_v24 = vmul.f32 %v4013_v19, %v1403_v30  ;;  %v1534_v37 = vadd.f32 %v4859_v4, %v3721_v20 }
 0x1a9   : > { %v1409_v42 = vsel %vm1380_vm2, %v4858_v9, %v4857_v11  ;;  %2703 = vmatprep.mubr.msk.bf16.mxu1 %vm1895_vm3, %v1835_v56  ;;  %v1809_v39 = vmin.f32 %v1777_v50, 6.0  ;;  %v1669_v29 = vadd.f32 %v1637_v27, %v1600_v6  ;;  %v1570_v47 = vmul.f32 %v4056_v48, %v1406_v57  ;;  %v4868_v9 = vld [vmem:[#allocation61_spill] sm:$0xff] }
 0x1aa   : > { %v1571_v21 = vmul.f32 %v4056_v48, %v4856_v32  ;;  %v1810_v44 = vmin.f32 %v1778_v62, 6.0  ;;  %v1670_v25 = vadd.f32 %v1638_v2, %v1601_v0  ;;  %v1533_v28 = vadd.f32 %v1501_v24, %v3657_v15  ;;  %v4867_v2 = vld [vmem:[#allocation63_spill] sm:$0xff] }
 0x1ab   : > { %v1639_v14 = vmul.f32 %v4188_v38, %v1409_v42  ;;  %v1708_v30 = vmul.f32 %v3791_v31, %v1669_v29  ;;  %v1640_v20 = vmul.f32 %v4188_v38, %v4860_v45  ;;  %v4862_v53 = vrot.slane %v4861_v18, 1  ;;  %v4872_v18 = vld [vmem:[#allocation30_spill] sm:$0xff] }
 0x1ac   : > { %v1603_v26 = vadd.f32 %v1571_v21, %v1534_v37  ;;  %v4864_v1 = vrot.slane %v4863_v46, 1  ;;  %v1836_v34 = vpack.c.bf16 %v1810_v44, %v1809_v39  ;;  %v1709_v52 = vmul.f32 %v3791_v31, %v1670_v25  ;;  %v4870_v21 = vld [vmem:[#allocation67_spill] sm:$0xff] }
 0x1ad   : > { %v1602_v23 = vadd.f32 %v1570_v47, %v1533_v28  ;;  %v1503_v15 = vmul.f32 %v4013_v19, %v1406_v57  ;;  %v1747_v33 = vadd.f32 %v3812_v22, %v1708_v30  ;;  %v1536_v12 = vadd.f32 %v4866_v5, %v4865_v60  ;;  %v4873_v46 = vld [vmem:[#allocation35_spill] sm:$0xff] }
 0x1ae   : > { %v1412_v43 = vsel %vm1380_vm2, %v4864_v1, %v4862_v53  ;;  %v1672_v54 = vadd.f32 %v1640_v20, %v1603_v26  ;;  %v1572_v61 = vmul.f32 %v4056_v48, %v1409_v42  ;;  %2704 = vmatmul.mubr.msk.bf16.gmra.mrb[4].mxu1 %vm1895_vm3, %v1836_v34  ;;  %v1748_v27 = vadd.f32 %v3812_v22, %v1709_v52  ;;  %v4874_v1 = vld [vmem:[#allocation66_spill] sm:$0xff] }
 0x1af   : > { %v1671_v32 = vadd.f32 %v1639_v14, %v1602_v23  ;;  %v1535_v56 = vadd.f32 %v1503_v15, %v4867_v2  ;;  %v1573_v50 = vmul.f32 %v4056_v48, %v4860_v45  ;;  %v1779_v6 = vmax.f32 %v1747_v33, 0.0 }
 0x1b0   : > { %v1711_v57 = vmul.f32 %v3791_v31, %v1672_v54  ;;  %v1641_v11 = vmul.f32 %v4188_v38, %v1412_v43  ;;  %v1642_v62 = vmul.f32 %v4188_v38, %v4868_v9  ;;  %v1780_v0 = vmax.f32 %v1748_v27, 0.0 }
 0x1b1   : > { %v1710_v24 = vmul.f32 %v3791_v31, %v1671_v32  ;;  %v1604_v4 = vadd.f32 %v1572_v61, %v1535_v56  ;;  %v1605_v37 = vadd.f32 %v1573_v50, %v1536_v12  ;;  %v1811_v39 = vmin.f32 %v1779_v6, 6.0  ;;  %v4875_v32 = vld [vmem:[#allocation27_spill] sm:$0xff]  ;;  %v4876_v6 = vld [vmem:[#allocation68_spill] sm:$0xff] }
 0x1b2   : > { %v1750_v29 = vadd.f32 %v3812_v22, %v1711_v57  ;;  %v4869_v47 = vrot.slane %v3784_v58, 1  ;;  %v4871_v44 = vrot.slane %v4870_v21, 1  ;;  %v1505_v28 = vmul.f32 %v4013_v19, %v1409_v42 }
 0x1b3   : > { %v1812_v14 = vmin.f32 %v1780_v0, 6.0  ;;  %v1749_v30 = vadd.f32 %v3812_v22, %v1710_v24  ;;  %v1673_v26 = vadd.f32 %v1641_v11, %v1604_v4  ;;  %v1674_v45 = vadd.f32 %v1642_v62, %v1605_v37  ;;  %v4878_v11 = vld [vmem:[#allocation65_spill] sm:$0xff] }
 0x1b4   : > { %v1415_v25 = vsel %vm1380_vm2, %v4871_v44, %v4869_v47  ;;  %v1782_v20 = vmax.f32 %v1750_v29, 0.0  ;;  %v1537_v53 = vadd.f32 %v1505_v28, %v4872_v18  ;;  %v1538_v34 = vadd.f32 %v4874_v1, %v4873_v46  ;;  %v4881_v29 = vld [vmem:[#allocation62_spill] sm:$0xff]  ;;  %v4882_v28 = vld [vmem:[#allocation9_spill] sm:$0xff]  ;;  %v4883_v1 = vld [vmem:[#allocation15_spill] sm:$0xff] }
 0x1b5   : > { %v1574_v52 = vmul.f32 %v4056_v48, %v1412_v43  ;;  %v1837_v58 = vpack.c.bf16 %v1812_v14, %v1811_v39  ;;  %v1781_v23 = vmax.f32 %v1749_v30, 0.0  ;;  %v1712_v15 = vmul.f32 %v3791_v31, %v1673_v26  ;;  %v4880_v39 = vld [vmem:[#allocation70_spill] sm:$0xff] }
 0x1b6   : > { %v1713_v33 = vmul.f32 %v3791_v31, %v1674_v45  ;;  %v1814_v42 = vmin.f32 %v1782_v20, 6.0  ;;  %v1575_v54 = vmul.f32 %v4056_v48, %v4868_v9  ;;  %v1643_v5 = vmul.f32 %v4188_v38, %v1415_v25 }
 0x1b7   : > { %v1606_v60 = vadd.f32 %v1574_v52, %v1537_v53  ;;  %2707 = vmatprep.mubr.msk.bf16.mxu1 %vm1895_vm3, %v1837_v58  ;;  %v1813_v12 = vmin.f32 %v1781_v23, 6.0  ;;  %v1751_v61 = vadd.f32 %v3812_v22, %v1712_v15  ;;  %v1644_v2 = vmul.f32 %v4188_v38, %v4875_v32  ;;  %v4884_v23 = vld [vmem:[#allocation23_spill] sm:$0xff] }
 0x1b8   : > { %v1752_v27 = vadd.f32 %v3812_v22, %v1713_v33  ;;  %v1607_v56 = vadd.f32 %v1575_v54, %v1538_v34  ;;  %v4877_v57 = vrot.slane %v4876_v6, 1  ;;  %v4879_v62 = vrot.slane %v4878_v11, 1  ;;  %v4886_v33 = vld [vmem:[#allocation69_spill] sm:$0xff] }
 0x1b9   : > { %v1675_v50 = vadd.f32 %v1643_v5, %v1606_v60  ;;  %v1507_v0 = vmul.f32 %v4013_v19, %v1412_v43  ;;  %v1838_v24 = vpack.c.bf16 %v1814_v42, %v1813_v12  ;;  %v1783_v4 = vmax.f32 %v1751_v61, 0.0 }
 0x1ba   : > { %v1418_v9 = vsel %vm1380_vm2, %v4879_v62, %v4877_v57  ;;  %v1784_v37 = vmax.f32 %v1752_v27, 0.0  ;;  %v1540_v47 = vadd.f32 %v4881_v29, %v4880_v39  ;;  %v1676_v21 = vadd.f32 %v1644_v2, %v1607_v56  ;;  %v4888_v27 = vld [vmem:[#allocation6_spill] sm:$0xff]  ;;  %v4891_v29 = vld [vmem:[#allocation40_spill] sm:$0xff] }
 0x1bb   : > { %v1714_v44 = vmul.f32 %v3791_v31, %v1675_v50  ;;  %v1539_v14 = vadd.f32 %v1507_v0, %v4882_v28  ;;  %v1576_v30 = vmul.f32 %v4056_v48, %v1415_v25  ;;  %2708 = vmatmul.mubr.msk.bf16.gmra.mrb[8].mxu1 %vm1895_vm3, %v1838_v24  ;;  %v1815_v26 = vmin.f32 %v1783_v4, 6.0  ;;  %v4890_v50 = vld [vmem:[#allocation8_spill] sm:$0xff] }
 0x1bc   : > { %v1816_v45 = vmin.f32 %v1784_v37, 6.0  ;;  %v1577_v43 = vmul.f32 %v4056_v48, %v4875_v32  ;;  %v1645_v20 = vmul.f32 %v4188_v38, %v1418_v9  ;;  %v1715_v18 = vmul.f32 %v3791_v31, %v1676_v21  ;;  %v4889_v32 = vld [vmem:[#allocation32_spill] sm:$0xff] }
 0x1bd   : > { %v1753_v53 = vadd.f32 %v3812_v22, %v1714_v44  ;;  %v1608_v46 = vadd.f32 %v1576_v30, %v1539_v14  ;;  %v1646_v34 = vmul.f32 %v4188_v38, %v4883_v1  ;;  %v4885_v15 = vrot.slane %v4884_v23, 1  ;;  %v4892_v28 = vld [vmem:[#allocation36_spill] sm:$0xff]  ;;  %v4898_v23 = vld [vmem:[#allocation19_spill] sm:$0xff] }
 0x1be   : > { %v1839_v52 = vpack.c.bf16 %v1816_v45, %v1815_v26  ;;  %v1609_v58 = vadd.f32 %v1577_v43, %v1540_v47  ;;  %v4887_v42 = vrot.slane %v4886_v33, 1  ;;  %v1509_v60 = vmul.f32 %v4013_v19, %v1415_v25  ;;  %v4894_v30 = vld [vmem:[#allocation28_spill] sm:$0xff] }
 0x1bf   : > { %v1754_v5 = vadd.f32 %v3812_v22, %v1715_v18  ;;  %v1785_v12 = vmax.f32 %v1753_v53, 0.0  ;;  %v1677_v61 = vadd.f32 %v1645_v20, %v1608_v46  ;;  %v1542_v2 = vadd.f32 %v4889_v32, %v4888_v27  ;;  %v4896_v46 = vld [vmem:[#allocation37_spill] sm:$0xff]  ;;  %v4899_v32 = vld [vmem:[#allocation20_spill] sm:$0xff] }
 0x1c0   : > { %v1421_v54 = vsel %vm1380_vm2, %v4887_v42, %v4885_v15  ;;  %2711 = vmatprep.mubr.msk.bf16.mxu1 %vm1895_vm3, %v1839_v52  ;;  %v1678_v56 = vadd.f32 %v1646_v34, %v1609_v58  ;;  %v1541_v6 = vadd.f32 %v1509_v60, %v4890_v50  ;;  %v1578_v57 = vmul.f32 %v4056_v48, %v1418_v9 }
 0x1c1   : > { %v1579_v11 = vmul.f32 %v4056_v48, %v4883_v1  ;;  %v1786_v62 = vmax.f32 %v1754_v5, 0.0  ;;  %v1817_v0 = vmin.f32 %v1785_v12, 6.0  ;;  %v1716_v25 = vmul.f32 %v3791_v31, %v1677_v61  ;;  %v4897_v1 = vld [vmem:[#allocation11_spill] sm:$0xff] }
 0x1c2   : > { %v1647_v24 = vmul.f32 %v4188_v38, %v1421_v54  ;;  %v1717_v4 = vmul.f32 %v3791_v31, %v1678_v56  ;;  %v1610_v37 = vadd.f32 %v1578_v57, %v1541_v6  ;;  %v1648_v47 = vmul.f32 %v4188_v38, %v4891_v29 }
 0x1c3   : > { %v1611_v39 = vadd.f32 %v1579_v11, %v1542_v2  ;;  %v1818_v21 = vmin.f32 %v1786_v62, 6.0  ;;  %v1755_v44 = vadd.f32 %v3812_v22, %v1716_v25  ;;  %v4893_v14 = vrot.slane %v4892_v28, 1 }
 0x1c4   : > { %v4895_v26 = vrot.slane %v4894_v30, 1  ;;  %v1511_v43 = vmul.f32 %v4013_v19, %v1418_v9  ;;  %v1756_v20 = vadd.f32 %v3812_v22, %v1717_v4  ;;  %v1679_v18 = vadd.f32 %v1647_v24, %v1610_v37  ;;  %v4901_v24 = vld [vmem:[#allocation29_spill] sm:$0xff] }
 0x1c5   : > { %v1680_v53 = vadd.f32 %v1648_v47, %v1611_v39  ;;  %v1544_v34 = vadd.f32 %v4897_v1, %v4896_v46  ;;  %v1840_v52 = vpack.c.bf16 %v1818_v21, %v1817_v0  ;;  %v1787_v58 = vmax.f32 %v1755_v44, 0.0 }
 0x1c6   : > { %v1424_v45 = vsel %vm1380_vm2, %v4895_v26, %v4893_v14  ;;  %v1543_v15 = vadd.f32 %v1511_v43, %v4898_v23  ;;  %v1580_v33 = vmul.f32 %v4056_v48, %v1421_v54  ;;  %v1788_v42 = vmax.f32 %v1756_v20, 0.0 }
 0x1c7   : > { %v1718_v60 = vmul.f32 %v3791_v31, %v1679_v18  ;;  %v1719_v5 = vmul.f32 %v3791_v31, %v1680_v53  ;;  %v1581_v9 = vmul.f32 %v4056_v48, %v4891_v29  ;;  %2712 = vmatmul.mubr.msk.bf16.gmra.mrb[12].mxu1 %vm1895_vm3, %v1840_v52  ;;  %v1819_v12 = vmin.f32 %v1787_v58, 6.0  ;;  %v4902_v53 = vld [vmem:[#allocation16_spill] sm:$0xff] }
 0x1c8   : > { %v1612_v61 = vadd.f32 %v1580_v33, %v1543_v15  ;;  %v1649_v27 = vmul.f32 %v4188_v38, %v1424_v45  ;;  %v1650_v2 = vmul.f32 %v4188_v38, %v4899_v32  ;;  %v1820_v56 = vmin.f32 %v1788_v42, 6.0 }
 0x1c9   : > { %v1757_v50 = vadd.f32 %v3812_v22, %v1718_v60  ;;  %v1758_v6 = vadd.f32 %v3812_v22, %v1719_v5  ;;  %v1613_v57 = vadd.f32 %v1581_v9, %v1544_v34  ;;  %v4900_v62 = vrot.slane %v4106_v10, 1 }
 0x1ca   : > { %v1681_v11 = vadd.f32 %v1649_v27, %v1612_v61  ;;  %v1513_v25 = vmul.f32 %v4013_v19, %v1421_v54  ;;  %v1546_v4 = vadd.f32 %v4901_v24, %v4262_v8  ;;  %v1841_v37 = vpack.c.bf16 %v1820_v56, %v1819_v12 }
 0x1cb   : > { %v1427_v0 = vsel %vm1380_vm2, %v4900_v62, %v1426_v17  ;;  %v1789_v39 = vmax.f32 %v1757_v50, 0.0  ;;  %v1790_v29 = vmax.f32 %v1758_v6, 0.0  ;;  %v1682_v47 = vadd.f32 %v1650_v2, %v1613_v57  ;;  %v4903_v50 = vld [vmem:[#allocation3_spill] sm:$0xff] }
 0x1cc   : > { %v1720_v21 = vmul.f32 %v3791_v31, %v1681_v11  ;;  %v1545_v44 = vadd.f32 %v1513_v25, %v4168_v55  ;;  %v1582_v28 = vmul.f32 %v4056_v48, %v1424_v45  ;;  %v1583_v10 = vmul.f32 %v4056_v48, %v4899_v32  ;;  %2715 = vmatprep.mubr.msk.bf16.mxu1 %vm1895_vm3, %v1841_v37 }
 0x1cd   : > { %v1821_v40 = vmin.f32 %v1789_v39, 6.0  ;;  %v1822_v17 = vmin.f32 %v1790_v29, 6.0  ;;  %v1721_v54 = vmul.f32 %v3791_v31, %v1682_v47  ;;  %v1651_v8 = vmul.f32 %v4188_v38, %v1427_v0 }
 0x1ce   : > { %v1759_v14 = vadd.f32 %v3812_v22, %v1720_v21  ;;  %v1614_v30 = vadd.f32 %v1582_v28, %v1545_v44  ;;  %v1615_v26 = vadd.f32 %v1583_v10, %v1546_v4  ;;  %v1652_v55 = vmul.f32 %v4188_v38, %v4226_v59 }
 0x1cf   : > { %v1842_v43 = vpack.c.bf16 %v1822_v17, %v1821_v40  ;;  %v1760_v20 = vadd.f32 %v3812_v22, %v1721_v54  ;;  %v1515_v18 = vmul.f32 %v4013_v19, %v1424_v45  ;;  %v1548_v46 = vadd.f32 %v4902_v53, %v4268_v51 }
 0x1d0   : > { %v1791_v1 = vmax.f32 %v1759_v14, 0.0  ;;  %v1683_v34 = vadd.f32 %v1651_v8, %v1614_v30  ;;  %v1684_v52 = vadd.f32 %v1652_v55, %v1615_v26  ;;  %v1584_v58 = vmul.f32 %v4056_v48, %v1427_v0  ;;  %v4464_v55 = vld [vmem:[%s4633_s8] ss:$0 sm:$0xff] }
 0x1d1   : > { %2716 = vmatmul.mubr.msk.bf16.gmra.mrb[16].mxu1 %vm1895_vm3, %v1842_v43  ;;  %v1792_v23 = vmax.f32 %v1760_v20, 0.0  ;;  %v1547_v15 = vadd.f32 %v1515_v18, %v4176_v16  ;;  %v1585_v33 = vmul.f32 %v4056_v48, %v4226_v59  ;;  %v1653_v42 = vmul.f32 %v4188_v38, %v4173_v7  ;;  %v2799_v18 = vld [vmem:[%s2898_s20 + $0x8] sm:$0xff]  }
 0x1d2   : > { %v1823_v45 = vmin.f32 %v1791_v1, 6.0  ;;  %v1722_v60 = vmul.f32 %v3791_v31, %v1683_v34  ;;  %v1723_v51 = vmul.f32 %v3791_v31, %v1684_v52  ;;  %v1347_v5 = vmul.f32 0.0, %v3921_v49  ;;  %v2800_v1 = vld [vmem:[%s2898_s20] sm:$0xff]  }
 0x1d3   : > { %v1824_v9 = vmin.f32 %v1792_v23, 6.0  ;;  %v1616_v12 = vadd.f32 %v1584_v58, %v1547_v15  ;;  %v1617_v61 = vadd.f32 %v1585_v33, %v1548_v46  ;;  %v1517_v27 = vmul.f32 %v4013_v19, %v1427_v0  ;;  %v4904_v0 = vld [vmem:[#allocation4_spill] sm:$0xff] }
 0x1d4   : > { %v1761_v16 = vadd.f32 %v3812_v22, %v1722_v60  ;;  %v1762_v32 = vadd.f32 %v3812_v22, %v1723_v51  ;;  %v1378_v48 = vadd.f32 %v1347_v5, %v4166_v3  ;;  %v1379_v7 = vadd.f32 %v1347_v5, %v4260_v36 }
 0x1d5   : > { %v1843_v59 = vpack.c.bf16 %v1824_v9, %v1823_v45  ;;  %v1685_v2 = vadd.f32 %v1653_v42, %v1616_v12  ;;  %v1686_v56 = vadd.f32 %v4191_v41, %v1617_v61  ;;  %v1655_v49 = vmul.f32 %v4188_v38, %v4903_v50  ;;  %v2801_v50 = vld [vmem:[%s2898_s20 + $0x18] sm:$0xff]  }
 0x1d6   : > { %v1793_v6 = vmax.f32 %v1761_v16, 0.0  ;;  %v1794_v57 = vmax.f32 %v1762_v32, 0.0  ;;  %v1549_v11 = vadd.f32 %v1517_v27, %v1378_v48  ;;  %v1550_v19 = vadd.f32 %v4230_v63, %v1379_v7 }
 0x1d7   : > { %2719 = vmatprep.mubr.msk.bf16.mxu1 %vm1895_vm3, %v1843_v59  ;;  %v1724_v62 = vmul.f32 %v3791_v31, %v1685_v2  ;;  %v1725_v3 = vmul.f32 %v3791_v31, %v1686_v56  ;;  %v1656_v36 = vmul.f32 %v4188_v38, %v4904_v0  ;;  %v2798_v31 = vld [vmem:[%s4630_s5] ss:$0 sm:$0xff]  ;;  %v2185_v53 = vunpack.c.l.bf16 %v2799_v18 }
 0x1d8   : > { %v1825_v25 = vmin.f32 %v1793_v6, 6.0  ;;  %v1826_v24 = vmin.f32 %v1794_v57, 6.0  ;;  %v1618_v41 = vadd.f32 %v4180_v13, %v1549_v11  ;;  %v1619_v4 = vadd.f32 %v4183_v35, %v1550_v19  ;;  %v2802_v11 = vld [vmem:[%s2898_s20 + $0x10] sm:$0xff]  }
 0x1d9   : > { %v1763_v37 = vadd.f32 %v3812_v22, %v1724_v62  ;;  %v1764_v39 = vadd.f32 %v3812_v22, %v1725_v3  ;;  %v2183_v34 = vunpack.c.l.bf16 %v2800_v1  ;;  %v2186_v33 = vunpack.c.h.bf16 %v2799_v18 }
 0x1da   : > { %v1844_v63 = vpack.c.bf16 %v1826_v24, %v1825_v25  ;;  %v1687_v29 = vadd.f32 %v1655_v49, %v1618_v41  ;;  %v1688_v47 = vadd.f32 %v1656_v36, %v1619_v4  ;;  %v2184_v45 = vunpack.c.h.bf16 %v2800_v1 }
 0x1db   : > { %v1795_v21 = vmax.f32 %v1763_v37, 0.0  ;;  %v1796_v44 = vmax.f32 %v1764_v39, 0.0  ;;  %v2189_v49 = vunpack.c.l.bf16 %v2801_v50  ;;  %v2187_v19 = vunpack.c.l.bf16 %v2802_v11 }
 0x1dc   : > { %2720 = vmatmul.mubr.msk.bf16.gmra.mrb[20].mxu1 %vm1895_vm3, %v1844_v63  ;;  %v1726_v38 = vmul.f32 %v2798_v31, %v1687_v29  ;;  %v1727_v28 = vmul.f32 %v2798_v31, %v1688_v47  ;;  %v2190_v36 = vunpack.c.h.bf16 %v2801_v50  ;;  %v2188_v4 = vunpack.c.h.bf16 %v2802_v11 }
 0x1dd   : > { %v1827_v13 = vmin.f32 %v1795_v21, 6.0  ;;  %v1828_v35 = vmin.f32 %v1796_v44, 6.0 }
 0x1de   : > { %v1765_v10 = vadd.f32 %v3812_v22, %v1726_v38  ;;  %v1766_v40 = vadd.f32 %v3812_v22, %v1727_v28  ;;  %v4469_v22 = vld [vmem:[%s4634_s9] ss:$0 sm:$0xff] }
 0x1df   : > { %v1845_v17 = vpack.c.bf16 %v1828_v35, %v1827_v13 }
 0x1e0   : > { %v1797_v54 = vmax.f32 %v1765_v10, 0.0  ;;  %v1798_v8 = vmax.f32 %v1766_v40, 0.0  ;;  %v2803_v10 = vld [vmem:[%s2898_s20 + $0x28] sm:$0xff]  }
 0x1e1   : > { %2723 = vmatprep.mubr.msk.bf16.mxu1 %vm1895_vm3, %v1845_v17  ;;  %v2193_v40 = vunpack.c.l.bf16 %v2803_v10 }
 0x1e2   : > { %v1829_v14 = vmin.f32 %v1797_v54, 6.0  ;;  %v1830_v30 = vmin.f32 %v1798_v8, 6.0  ;;  %v2804_v8 = vld [vmem:[%s2898_s20 + $0x20] sm:$0xff]  }
 0x1e3   : > { %v2192_v1 = vunpack.c.h.bf16 %v2804_v8 }
 0x1e4   : > { %v1846_v26 = vpack.c.bf16 %v1830_v30, %v1829_v14  ;;  %v2191_v14 = vunpack.c.l.bf16 %v2804_v8 }
 0x1e6   : > { %2724 = vmatmul.mubr.msk.bf16.gmra.mrb[24].mxu1 %vm1895_vm3, %v1846_v26 }
 0x241   : > { %v2697_v43 = vpop.f32.mrb[32].mxu0 }
 0x242   : > { %v2114_v20 = vmul.f32 %v2697_v43, %v4464_v55  ;;  %v1978_v46 = vpop.f32.mrb[33].mxu0 }
 0x243   : > { %v2112_v52 = vmul.f32 %v4464_v55, %v1978_v46  ;;  %v2698_v58 = vpop.f32.mrb[34].mxu0 }
 0x244   : > { %v2153_v23 = vadd.f32 %v4469_v22, %v2114_v20  ;;  %v2115_v15 = vmul.f32 %v2698_v58, %v4464_v55  ;;  %v1981_v42 = vpop.f32.mrb[35].mxu0  ;;  %v2194_v20 = vunpack.c.h.bf16 %v2803_v10 }
 0x245   : > { %v2151_v60 = vadd.f32 %v4469_v22, %v2112_v52  ;;  %v2113_v51 = vmul.f32 %v4464_v55, %v1981_v42 }
 0x246   : > { %v2217_v5 = vadd.f32 %v2185_v53, %v2153_v23  ;;  %v2154_v9 = vadd.f32 %v4469_v22, %v2115_v15 }
 0x247   : > { %v2215_v12 = vadd.f32 %v2183_v34, %v2151_v60  ;;  %v2152_v61 = vadd.f32 %v4469_v22, %v2113_v51 }
 0x248   : > { %v2580_v27 = vpack.c.bf16 %v2217_v5, %v2217_v5  ;;  %v2218_v16 = vadd.f32 %v2186_v33, %v2154_v9 }
 0x249   : > { %v2578_v32 = vpack.c.bf16 %v2215_v12, %v2215_v12  ;;  %v2216_v48 = vadd.f32 %v2184_v45, %v2152_v61  ;;  %v2805_v12 = vld [vmem:[%s2898_s20 + $0x38] sm:$0xff]  }
 0x24a   : > { %2378 = vst.msk [vmem:[%s4485_s25 + $0x8] sm:$0xf] %vm2375_vm4, %v2580_v27  ;;  %v2581_v7 = vpack.c.bf16 %v2218_v16, %v2218_v16  ;;  %v2197_v61 = vunpack.c.l.bf16 %v2805_v12 }
 0x24b   : > { %2376 = vst.msk [vmem:[%s4485_s25] sm:$0xf] %vm2375_vm4, %v2578_v32  ;;  %v2579_v59 = vpack.c.bf16 %v2216_v48, %v2216_v48  ;;  %v2806_v32 = vld [vmem:[%s2898_s20 + $0x30] sm:$0xff]  }
 0x24c   : > { %2379 = vst.msk [vmem:[%s4485_s25 + $0xc] sm:$0xf] %vm2375_vm4, %v2581_v7  ;;  %v2195_v48 = vunpack.c.l.bf16 %v2806_v32 }
 0x24d   : > { %2377 = vst.msk [vmem:[%s4485_s25 + $0x4] sm:$0xf] %vm2375_vm4, %v2579_v59 }
 0x268   : > { %v2701_v2 = vpop.f32.mrb[0].mxu1 }
 0x269   : > { %v2118_v56 = vmul.f32 %v2701_v2, %v4464_v55  ;;  %v1994_v6 = vpop.f32.mrb[1].mxu1 }
 0x26a   : > { %v2116_v57 = vmul.f32 %v4464_v55, %v1994_v6  ;;  %v2702_v62 = vpop.f32.mrb[2].mxu1 }
 0x26b   : > { %v2157_v3 = vadd.f32 %v4469_v22, %v2118_v56  ;;  %v2119_v0 = vmul.f32 %v2702_v62, %v4464_v55  ;;  %v1997_v25 = vpop.f32.mrb[3].mxu1  ;;  %v2198_v56 = vunpack.c.h.bf16 %v2805_v12 }
 0x26c   : > { %v2155_v24 = vadd.f32 %v4469_v22, %v2116_v57  ;;  %v2117_v41 = vmul.f32 %v4464_v55, %v1997_v25  ;;  %v2196_v57 = vunpack.c.h.bf16 %v2806_v32 }
 0x26d   : > { %v2221_v37 = vadd.f32 %v2189_v49, %v2157_v3  ;;  %v2158_v39 = vadd.f32 %v4469_v22, %v2119_v0 }
 0x26e   : > { %v2219_v63 = vadd.f32 %v2187_v19, %v2155_v24  ;;  %v2156_v29 = vadd.f32 %v4469_v22, %v2117_v41 }
 0x26f   : > { %v2584_v47 = vpack.c.bf16 %v2221_v37, %v2221_v37  ;;  %v2222_v21 = vadd.f32 %v2190_v36, %v2158_v39 }
 0x270   : > { %v2582_v44 = vpack.c.bf16 %v2219_v63, %v2219_v63  ;;  %v2220_v31 = vadd.f32 %v2188_v4, %v2156_v29  ;;  %v2807_v63 = vld [vmem:[%s2898_s20 + $0x48] sm:$0xff]  }
 0x271   : > { %2382 = vst.msk [vmem:[%s4485_s25 + $0x18] sm:$0xf] %vm2375_vm4, %v2584_v47  ;;  %v2585_v38 = vpack.c.bf16 %v2222_v21, %v2222_v21  ;;  %v2201_v29 = vunpack.c.l.bf16 %v2807_v63 }
 0x272   : > { %2380 = vst.msk [vmem:[%s4485_s25 + $0x10] sm:$0xf] %vm2375_vm4, %v2582_v44  ;;  %v2583_v28 = vpack.c.bf16 %v2220_v31, %v2220_v31  ;;  %v2808_v44 = vld [vmem:[%s2898_s20 + $0x40] sm:$0xff]  }
 0x273   : > { %2383 = vst.msk [vmem:[%s4485_s25 + $0x1c] sm:$0xf] %vm2375_vm4, %v2585_v38  ;;  %v2199_v31 = vunpack.c.l.bf16 %v2808_v44 }
 0x274   : > { %2381 = vst.msk [vmem:[%s4485_s25 + $0x14] sm:$0xf] %vm2375_vm4, %v2583_v28 }
 0x281   : > { %v2705_v13 = vpop.f32.mrb[4].mxu1 }
 0x282   : > { %v2122_v35 = vmul.f32 %v2705_v13, %v4464_v55  ;;  %v2010_v17 = vpop.f32.mrb[5].mxu1 }
 0x283   : > { %v2120_v54 = vmul.f32 %v4464_v55, %v2010_v17  ;;  %v2706_v30 = vpop.f32.mrb[6].mxu1 }
 0x284   : > { %v2161_v26 = vadd.f32 %v4469_v22, %v2122_v35  ;;  %v2123_v43 = vmul.f32 %v2706_v30, %v4464_v55  ;;  %v2013_v18 = vpop.f32.mrb[7].mxu1  ;;  %v2202_v35 = vunpack.c.h.bf16 %v2807_v63 }
 0x285   : > { %v2159_v53 = vadd.f32 %v4469_v22, %v2120_v54  ;;  %v2121_v46 = vmul.f32 %v4464_v55, %v2013_v18  ;;  %v2200_v54 = vunpack.c.h.bf16 %v2808_v44 }
 0x286   : > { %v2225_v34 = vadd.f32 %v2193_v40, %v2161_v26  ;;  %v2162_v52 = vadd.f32 %v4469_v22, %v2123_v43 }
 0x287   : > { %v2223_v58 = vadd.f32 %v2191_v14, %v2159_v53  ;;  %v2160_v23 = vadd.f32 %v4469_v22, %v2121_v46 }
 0x288   : > { %v2588_v15 = vpack.c.bf16 %v2225_v34, %v2225_v34  ;;  %v2226_v33 = vadd.f32 %v2194_v20, %v2162_v52 }
 0x289   : > { %v2586_v42 = vpack.c.bf16 %v2223_v58, %v2223_v58  ;;  %v2224_v45 = vadd.f32 %v2192_v1, %v2160_v23  ;;  %v2809_v58 = vld [vmem:[%s2898_s20 + $0x58] sm:$0xff]  }
 0x28a   : > { %2386 = vst.msk [vmem:[%s4485_s25 + $0x28] sm:$0xf] %vm2375_vm4, %v2588_v15  ;;  %v2589_v60 = vpack.c.bf16 %v2226_v33, %v2226_v33  ;;  %v2205_v23 = vunpack.c.l.bf16 %v2809_v58 }
 0x28b   : > { %2384 = vst.msk [vmem:[%s4485_s25 + $0x20] sm:$0xf] %vm2375_vm4, %v2586_v42  ;;  %v2587_v51 = vpack.c.bf16 %v2224_v45, %v2224_v45  ;;  %v2810_v42 = vld [vmem:[%s2898_s20 + $0x50] sm:$0xff]  }
 0x28c   : > { %2387 = vst.msk [vmem:[%s4485_s25 + $0x2c] sm:$0xf] %vm2375_vm4, %v2589_v60  ;;  %v2203_v45 = vunpack.c.l.bf16 %v2810_v42 }
 0x28d   : > { %2385 = vst.msk [vmem:[%s4485_s25 + $0x24] sm:$0xf] %vm2375_vm4, %v2587_v51 }
 0x28e   : > { %v2709_v5 = vpop.f32.mrb[8].mxu1 }
 0x28f   : > { %v2126_v9 = vmul.f32 %v2709_v5, %v4464_v55  ;;  %v2026_v27 = vpop.f32.mrb[9].mxu1 }
 0x290   : > { %v2124_v16 = vmul.f32 %v4464_v55, %v2026_v27  ;;  %v2710_v7 = vpop.f32.mrb[10].mxu1 }
 0x291   : > { %v2165_v59 = vadd.f32 %v4469_v22, %v2126_v9  ;;  %v2127_v2 = vmul.f32 %v2710_v7, %v4464_v55  ;;  %v2029_v50 = vpop.f32.mrb[11].mxu1  ;;  %v2206_v9 = vunpack.c.h.bf16 %v2809_v58 }
 0x292   : > { %v2163_v49 = vadd.f32 %v4469_v22, %v2124_v16  ;;  %v2125_v6 = vmul.f32 %v4464_v55, %v2029_v50  ;;  %v2204_v16 = vunpack.c.h.bf16 %v2810_v42 }
 0x293   : > { %v2229_v11 = vadd.f32 %v2197_v61, %v2165_v59  ;;  %v2166_v19 = vadd.f32 %v4469_v22, %v2127_v2 }
 0x294   : > { %v2227_v62 = vadd.f32 %v2195_v48, %v2163_v49  ;;  %v2164_v3 = vadd.f32 %v4469_v22, %v2125_v6 }
 0x295   : > { %v2592_v0 = vpack.c.bf16 %v2229_v11, %v2229_v11  ;;  %v2230_v36 = vadd.f32 %v2198_v56, %v2166_v19 }
 0x296   : > { %v2590_v25 = vpack.c.bf16 %v2227_v62, %v2227_v62  ;;  %v2228_v24 = vadd.f32 %v2196_v57, %v2164_v3  ;;  %v2811_v62 = vld [vmem:[%s2898_s20 + $0x68] sm:$0xff]  }
 0x297   : > { %2390 = vst.msk [vmem:[%s4485_s25 + $0x38] sm:$0xf] %vm2375_vm4, %v2592_v0  ;;  %v2593_v41 = vpack.c.bf16 %v2230_v36, %v2230_v36  ;;  %v2209_v3 = vunpack.c.l.bf16 %v2811_v62 }
 0x298   : > { %2388 = vst.msk [vmem:[%s4485_s25 + $0x30] sm:$0xf] %vm2375_vm4, %v2590_v25  ;;  %v2591_v4 = vpack.c.bf16 %v2228_v24, %v2228_v24  ;;  %v2812_v25 = vld [vmem:[%s2898_s20 + $0x60] sm:$0xff]  }
 0x299   : > { %2391 = vst.msk [vmem:[%s4485_s25 + $0x3c] sm:$0xf] %vm2375_vm4, %v2593_v41  ;;  %v2207_v24 = vunpack.c.l.bf16 %v2812_v25 }
 0x29a   : > { %v2713_v37 = vpop.f32.mrb[12].mxu1  ;;  %2389 = vst.msk [vmem:[%s4485_s25 + $0x34] sm:$0xf] %vm2375_vm4, %v2591_v4 }
 0x29b   : > { %v2130_v39 = vmul.f32 %v2713_v37, %v4464_v55  ;;  %v2042_v47 = vpop.f32.mrb[13].mxu1 }
 0x29c   : > { %v2128_v21 = vmul.f32 %v4464_v55, %v2042_v47  ;;  %v2714_v38 = vpop.f32.mrb[14].mxu1 }
 0x29d   : > { %v2169_v28 = vadd.f32 %v4469_v22, %v2130_v39  ;;  %v2131_v13 = vmul.f32 %v2714_v38, %v4464_v55  ;;  %v2045_v10 = vpop.f32.mrb[15].mxu1  ;;  %v2210_v39 = vunpack.c.h.bf16 %v2811_v62 }
 0x29e   : > { %v2167_v40 = vadd.f32 %v4469_v22, %v2128_v21  ;;  %v2129_v17 = vmul.f32 %v4464_v55, %v2045_v10  ;;  %v2208_v21 = vunpack.c.h.bf16 %v2812_v25 }
 0x29f   : > { %v2233_v8 = vadd.f32 %v2201_v29, %v2169_v28  ;;  %v2170_v14 = vadd.f32 %v4469_v22, %v2131_v13 }
 0x2a0   : > { %v2231_v30 = vadd.f32 %v2199_v31, %v2167_v40  ;;  %v2168_v26 = vadd.f32 %v4469_v22, %v2129_v17 }
 0x2a1   : > { %v2596_v43 = vpack.c.bf16 %v2233_v8, %v2233_v8  ;;  %v2234_v20 = vadd.f32 %v2202_v35, %v2170_v14 }
 0x2a2   : > { %v2594_v18 = vpack.c.bf16 %v2231_v30, %v2231_v30  ;;  %v2232_v53 = vadd.f32 %v2200_v54, %v2168_v26  ;;  %v2813_v30 = vld [vmem:[%s2898_s20 + $0x78] sm:$0xff]  }
 0x2a3   : > { %2394 = vst.msk [vmem:[%s4485_s25 + $0x48] sm:$0xf] %vm2375_vm4, %v2596_v43  ;;  %v2597_v46 = vpack.c.bf16 %v2234_v20, %v2234_v20  ;;  %v2213_v26 = vunpack.c.l.bf16 %v2813_v30 }
 0x2a4   : > { %v2717_v1 = vpop.f32.mrb[16].mxu1  ;;  %2392 = vst.msk [vmem:[%s4485_s25 + $0x40] sm:$0xf] %vm2375_vm4, %v2594_v18  ;;  %v2595_v34 = vpack.c.bf16 %v2232_v53, %v2232_v53  ;;  %v2814_v18 = vld [vmem:[%s2898_s20 + $0x70] sm:$0xff]  }
 0x2a5   : > { %v2134_v52 = vmul.f32 %v2717_v1, %v4464_v55  ;;  %v2058_v15 = vpop.f32.mrb[17].mxu1  ;;  %2395 = vst.msk [vmem:[%s4485_s25 + $0x4c] sm:$0xf] %vm2375_vm4, %v2597_v46  ;;  %v2211_v53 = vunpack.c.l.bf16 %v2814_v18 }
 0x2a6   : > { %v2132_v33 = vmul.f32 %v4464_v55, %v2058_v15  ;;  %v2718_v60 = vpop.f32.mrb[18].mxu1  ;;  %2393 = vst.msk [vmem:[%s4485_s25 + $0x44] sm:$0xf] %vm2375_vm4, %v2595_v34 }
 0x2a7   : > { %v2173_v51 = vadd.f32 %v4469_v22, %v2134_v52  ;;  %v2135_v5 = vmul.f32 %v2718_v60, %v4464_v55  ;;  %v2061_v12 = vpop.f32.mrb[19].mxu1  ;;  %v2214_v52 = vunpack.c.h.bf16 %v2813_v30 }
 0x2a8   : > { %v2171_v61 = vadd.f32 %v4469_v22, %v2132_v33  ;;  %v2133_v27 = vmul.f32 %v4464_v55, %v2061_v12  ;;  %v2212_v33 = vunpack.c.h.bf16 %v2814_v18 }
 0x2a9   : > { %v2237_v32 = vadd.f32 %v2205_v23, %v2173_v51  ;;  %v2174_v48 = vadd.f32 %v4469_v22, %v2135_v5 }
 0x2aa   : > { %v2235_v7 = vadd.f32 %v2203_v45, %v2171_v61  ;;  %v2172_v59 = vadd.f32 %v4469_v22, %v2133_v27 }
 0x2ab   : > { %v2600_v2 = vpack.c.bf16 %v2237_v32, %v2237_v32  ;;  %v2238_v56 = vadd.f32 %v2206_v9, %v2174_v48 }
 0x2ac   : > { %v2598_v50 = vpack.c.bf16 %v2235_v7, %v2235_v7  ;;  %v2236_v49 = vadd.f32 %v2204_v16, %v2172_v59 }
 0x2ad   : > { %2398 = vst.msk [vmem:[%s4485_s25 + $0x58] sm:$0xf] %vm2375_vm4, %v2600_v2  ;;  %v2601_v6 = vpack.c.bf16 %v2238_v56, %v2238_v56 }
 0x2ae   : > { %2396 = vst.msk [vmem:[%s4485_s25 + $0x50] sm:$0xf] %vm2375_vm4, %v2598_v50  ;;  %v2599_v57 = vpack.c.bf16 %v2236_v49, %v2236_v49 }
 0x2af   : > { %2399 = vst.msk [vmem:[%s4485_s25 + $0x5c] sm:$0xf] %vm2375_vm4, %v2601_v6  ;;  %v2721_v11 = vpop.f32.mrb[20].mxu1 }
 0x2b0   : > { %2397 = vst.msk [vmem:[%s4485_s25 + $0x54] sm:$0xf] %vm2375_vm4, %v2599_v57  ;;  %v2138_v19 = vmul.f32 %v2721_v11, %v4464_v55  ;;  %v2074_v0 = vpop.f32.mrb[21].mxu1 }
 0x2b1   : > { %v2136_v36 = vmul.f32 %v4464_v55, %v2074_v0  ;;  %v2722_v41 = vpop.f32.mrb[22].mxu1 }
 0x2b2   : > { %v2177_v4 = vadd.f32 %v4469_v22, %v2138_v19  ;;  %v2139_v37 = vmul.f32 %v2722_v41, %v4464_v55  ;;  %v2077_v63 = vpop.f32.mrb[23].mxu1 }
 0x2b3   : > { %v2175_v29 = vadd.f32 %v4469_v22, %v2136_v36  ;;  %v2137_v47 = vmul.f32 %v4464_v55, %v2077_v63 }
 0x2b4   : > { %v2241_v44 = vadd.f32 %v2209_v3, %v2177_v4  ;;  %v2178_v31 = vadd.f32 %v4469_v22, %v2139_v37 }
 0x2b5   : > { %v2239_v38 = vadd.f32 %v2207_v24, %v2175_v29  ;;  %v2176_v28 = vadd.f32 %v4469_v22, %v2137_v47 }
 0x2b6   : > { %v2604_v13 = vpack.c.bf16 %v2241_v44, %v2241_v44  ;;  %v2242_v35 = vadd.f32 %v2210_v39, %v2178_v31 }
 0x2b7   : > { %v2602_v10 = vpack.c.bf16 %v2239_v38, %v2239_v38  ;;  %v2240_v40 = vadd.f32 %v2208_v21, %v2176_v28 }
 0x2b8   : > { %2402 = vst.msk [vmem:[%s4485_s25 + $0x68] sm:$0xf] %vm2375_vm4, %v2604_v13  ;;  %v2605_v17 = vpack.c.bf16 %v2242_v35, %v2242_v35 }
 0x2b9   : > { %2400 = vst.msk [vmem:[%s4485_s25 + $0x60] sm:$0xf] %vm2375_vm4, %v2602_v10  ;;  %v2603_v54 = vpack.c.bf16 %v2240_v40, %v2240_v40  ;;  %v2725_v8 = vpop.f32.mrb[24].mxu1 }
 0x2ba   : > { %2403 = vst.msk [vmem:[%s4485_s25 + $0x6c] sm:$0xf] %vm2375_vm4, %v2605_v17  ;;  %v2142_v14 = vmul.f32 %v2725_v8, %v4464_v55  ;;  %v2090_v43 = vpop.f32.mrb[25].mxu1 }
 0x2bb   : > { %2401 = vst.msk [vmem:[%s4485_s25 + $0x64] sm:$0xf] %vm2375_vm4, %v2603_v54  ;;  %v2140_v20 = vmul.f32 %v4464_v55, %v2090_v43  ;;  %v2726_v46 = vpop.f32.mrb[26].mxu1 }
 0x2bc   : > { %v2181_v1 = vadd.f32 %v4469_v22, %v2142_v14  ;;  %v2143_v34 = vmul.f32 %v2726_v46, %v4464_v55  ;;  %v2093_v58 = vpop.f32.mrb[27].mxu1 }
 0x2bd   : > { %v2179_v23 = vadd.f32 %v4469_v22, %v2140_v20  ;;  %v2141_v15 = vmul.f32 %v4464_v55, %v2093_v58 }
 0x2be   : > { %v2245_v42 = vadd.f32 %v2213_v26, %v2181_v1  ;;  %v2182_v45 = vadd.f32 %v4469_v22, %v2143_v34 }
 0x2bf   : > { %v2243_v60 = vadd.f32 %v2211_v53, %v2179_v23  ;;  %v2180_v51 = vadd.f32 %v4469_v22, %v2141_v15 }
 0x2c0   : > { %v2608_v5 = vpack.c.bf16 %v2245_v42, %v2245_v42  ;;  %v2246_v9 = vadd.f32 %v2214_v52, %v2182_v45 }
 0x2c1   : > { %v2606_v12 = vpack.c.bf16 %v2243_v60, %v2243_v60  ;;  %v2244_v61 = vadd.f32 %v2212_v33, %v2180_v51 }
 0x2c2   : > { %2406 = vst.msk [vmem:[%s4485_s25 + $0x78] sm:$0xf] %vm2375_vm4, %v2608_v5  ;;  %v2609_v27 = vpack.c.bf16 %v2246_v9, %v2246_v9 }
 0x2c3   : > { %2404 = vst.msk [vmem:[%s4485_s25 + $0x70] sm:$0xf] %vm2375_vm4, %v2606_v12  ;;  %v2607_v16 = vpack.c.bf16 %v2244_v61, %v2244_v61 }
 0x2c4   : > { %2407 = vst.msk [vmem:[%s4485_s25 + $0x7c] sm:$0xf] %vm2375_vm4, %v2609_v27 }
 0x2c5   : > { %2405 = vst.msk [vmem:[%s4485_s25 + $0x74] sm:$0xf] %vm2375_vm4, %v2607_v16 }
 0x2c6 PF: > { %s20_s13 = sadd.s32 1, %s2821_s13  }
 0x2c7   : > { %p17_p4 = scmp.ge.s32.totalorder %s20_s13, 4  }
 0x2c9   :  { %19 = sbr.rel (!%p17_p4) target bundleno = 1 (0x1), region = 90 }

</bundles_post_ra>
